<compile_context>
chip_gen: v7x
topology: tpu7x:2x2x1
jax: 0.10.0
libtpu: 0.0.40
codegen_flags: <defaults>
</compile_context>

<pallas_src>
import functools

import jax
import jax.numpy as jnp
from jax.experimental import pallas as pl
from jax.experimental.pallas import tpu as pltpu


_VMEM_LIMIT = 32 * 1024 * 1024     # explicit scoped-VMEM limit (portable v5e/v6e/v7x)
_VMEM_BUDGET = 24 * 1024 * 1024    # target residency for tile sizing (headroom)


def _round_up(x, m):
    return (x + m - 1) // m * m


# --------------------------------------------------------------------------
# Kernels
# --------------------------------------------------------------------------

def _gemm_bias_act_kernel(p_ref, w_ref, b_ref, o_ref, *, use_act):
    """Conv-as-GEMM + bias (+ LeakyReLU).  Used for the non-BN layers."""
    acc = jnp.dot(p_ref[...], w_ref[...], preferred_element_type=jnp.float32)
    acc = acc + b_ref[...]
    if use_act:
        acc = jnp.where(acc > 0, acc, 0.2 * acc)
    o_ref[...] = acc.astype(o_ref.dtype)


def _gemm_bn_act_fused_kernel(p_ref, w_ref, g_ref, bt_ref, o_ref, *, use_act):
    """Single-block path (tiny layers): GEMM + full-batch BN + LeakyReLU fused."""
    acc = jnp.dot(p_ref[...], w_ref[...], preferred_element_type=jnp.float32)
    # Training-mode BatchNorm2d: biased batch stats over all (N, H, W) rows.
    mean = jnp.mean(acc, axis=0, keepdims=True)
    var = jnp.mean((acc - mean) ** 2, axis=0, keepdims=True)
    acc = (acc - mean) * jax.lax.rsqrt(var + 1e-5)
    acc = acc * g_ref[...] + bt_ref[...]
    if use_act:
        acc = jnp.where(acc > 0, acc, 0.2 * acc)
    o_ref[...] = acc.astype(o_ref.dtype)


def _gemm_stats_kernel(p_ref, w_ref, y_ref, sum_ref, sq_ref):
    """Phase 1 (tiled BN layers): GEMM tile + accumulate per-channel sum/sumsq.

    sum_ref / sq_ref have a constant index_map across the rows grid axis, so
    they stay VMEM-resident and act as accumulators (axis is 'arbitrary')."""
    i = pl.program_id(0)
    acc = jnp.dot(p_ref[...], w_ref[...], preferred_element_type=jnp.float32)
    y_ref[...] = acc

    @pl.when(i == 0)
    def _():
        sum_ref[...] = jnp.zeros_like(sum_ref)
        sq_ref[...] = jnp.zeros_like(sq_ref)

    sum_ref[...] += jnp.sum(acc, axis=0, keepdims=True)
    sq_ref[...] += jnp.sum(acc * acc, axis=0, keepdims=True)


def _bn_act_kernel(y_ref, scale_ref, shift_ref, o_ref, *, use_act):
    """Phase 2 (tiled BN layers): y * scale + shift, then LeakyReLU."""
    y = y_ref[...] * scale_ref[...] + shift_ref[...]
    if use_act:
        y = jnp.where(y > 0, y, 0.2 * y)
    o_ref[...] = y.astype(o_ref.dtype)


# --------------------------------------------------------------------------
# Glue
# --------------------------------------------------------------------------

def _im2col_nhwc(x, k, stride, pad):
    """x: [N, H, W, C] -> patches [N*Ho*Wo, k*k*C], columns ordered (kh, kw, c)."""
    N, H, W, C = x.shape
    xp = jnp.pad(x, ((0, 0), (pad, pad), (pad, pad), (0, 0)))
    Ho = (H + 2 * pad - k) // stride + 1
    Wo = (W + 2 * pad - k) // stride + 1
    cols = []
    for dy in range(k):
        for dx in range(k):
            cols.append(
                xp[:, dy:dy + stride * Ho:stride, dx:dx + stride * Wo:stride, :])
    patches = jnp.stack(cols, axis=3)                  # [N, Ho, Wo, k*k, C]
    patches = patches.reshape(N * Ho * Wo, k * k * C)
    return patches, Ho, Wo


def _pick_row_tile(requested, K, Cp):
    """Shrink the rows tile until double-buffered residency fits the VMEM budget."""
    t = max(8, _round_up(requested, 8))

    def footprint(t_):
        return (2 * t_ * K * 2          # patches tile, bf16, double-buffered
                + 2 * K * Cp * 2        # weights, bf16
                + 2 * t_ * Cp * 4)      # output tile, f32, double-buffered

    while t > 8 and footprint(t) > _VMEM_BUDGET:
        t = max(8, _round_up(t // 2, 8))
    return t


def conv_block(x, w, b, gamma, beta, *, stride, pad, use_bn, use_act,
               row_tile=1024, out_dtype=jnp.bfloat16):
    """One (Conv2d [+BN] [+LeakyReLU]) block.  x: NHWC, w: OIHW (PyTorch)."""
    N, H, W, Cin = x.shape
    Cout, _, k, _ = w.shape

    patches, Ho, Wo = _im2col_nhwc(x, k, stride, pad)
    rows, K = patches.shape
    Cp = _round_up(Cout, 128)                      # lane-dense output stores

    patches = patches.astype(jnp.bfloat16)
    # OIHW -> (kh, kw, cin, cout) to match the (kh, kw, c) patch-column order.
    wmat = w.transpose(2, 3, 1, 0).reshape(K, Cout)
    wmat = jnp.pad(wmat, ((0, 0), (0, Cp - Cout))).astype(jnp.bfloat16)

    def pad_vec(v):
        return jnp.pad(v, (0, Cp - Cout)).reshape(1, Cp).astype(jnp.float32)

    tile = _pick_row_tile(row_tile, K, Cp)
    out_bytes = jnp.dtype(out_dtype).itemsize

    if rows <= tile:
        # ---- tiny layer: single block, fully fused, everything VMEM-resident.
        vm = pl.BlockSpec(memory_space=pltpu.MemorySpace.VMEM)
        cost = pl.CostEstimate(
            flops=2 * rows * K * Cp, transcendentals=0,
            bytes_accessed=rows * K * 2 + K * Cp * 2 + rows * Cp * out_bytes)
        cparams = pltpu.CompilerParams(vmem_limit_bytes=_VMEM_LIMIT)
        if use_bn:
            out = pl.pallas_call(
                functools.partial(_gemm_bn_act_fused_kernel, use_act=use_act),
                out_shape=jax.ShapeDtypeStruct((rows, Cp), out_dtype),
                in_specs=[vm] * 4, out_specs=vm,
                compiler_params=cparams, cost_estimate=cost,
            )(patches, wmat, pad_vec(gamma), pad_vec(beta))
        else:
            out = pl.pallas_call(
                functools.partial(_gemm_bias_act_kernel, use_act=use_act),
                out_shape=jax.ShapeDtypeStruct((rows, Cp), out_dtype),
                in_specs=[vm] * 3, out_specs=vm,
                compiler_params=cparams, cost_estimate=cost,
            )(patches, wmat, pad_vec(b))
    else:
        # ---- pipelined path: grid over row tiles.
        rows_p = _round_up(rows, tile)
        if rows_p != rows:
            # Padded rows are all-zero patches -> zero conv output (BN layers
            # have no bias), so BN statistics are unaffected; sliced off below.
            patches = jnp.pad(patches, ((0, rows_p - rows), (0, 0)))
        g = rows_p // tile

        p_spec = pl.BlockSpec((tile, K), lambda i: (i, 0))
        w_spec = pl.BlockSpec((K, Cp), lambda i: (0, 0))
        v_spec = pl.BlockSpec((1, Cp), lambda i: (0, 0))
        o_spec = pl.BlockSpec((tile, Cp), lambda i: (i, 0))
        gemm_cost = pl.CostEstimate(
            flops=2 * rows_p * K * Cp, transcendentals=0,
            bytes_accessed=rows_p * K * 2 + K * Cp * 2 + rows_p * Cp * 4)

        if not use_bn:
            out = pl.pallas_call(
                functools.partial(_gemm_bias_act_kernel, use_act=use_act),
                out_shape=jax.ShapeDtypeStruct((rows_p, Cp), out_dtype),
                grid=(g,),
                in_specs=[p_spec, w_spec, v_spec],
                out_specs=o_spec,
                compiler_params=pltpu.CompilerParams(
                    dimension_semantics=("parallel",),
                    vmem_limit_bytes=_VMEM_LIMIT),
                cost_estimate=gemm_cost,
            )(patches, wmat, pad_vec(b))
        else:
            # Phase 1: tiled GEMM + per-channel sum / sum-of-squares.
            y, ssum, ssq = pl.pallas_call(
                _gemm_stats_kernel,
                out_shape=(jax.ShapeDtypeStruct((rows_p, Cp), jnp.float32),
                           jax.ShapeDtypeStruct((1, Cp), jnp.float32),
                           jax.ShapeDtypeStruct((1, Cp), jnp.float32)),
                grid=(g,),
                in_specs=[p_spec, w_spec],
                out_specs=(o_spec, v_spec, v_spec),
                compiler_params=pltpu.CompilerParams(
                    dimension_semantics=("arbitrary",),
                    vmem_limit_bytes=_VMEM_LIMIT),
                cost_estimate=gemm_cost,
            )(patches, wmat)

            # Full-batch (biased) statistics over the TRUE rows, like PyTorch
            # BatchNorm2d in train(); tiny [1, Cp] glue math.
            mean = ssum / rows
            var = jnp.maximum(ssq / rows - mean * mean, 0.0)
            inv = jax.lax.rsqrt(var + 1e-5)
            scale = pad_vec(gamma) * inv
            shift = pad_vec(beta) - mean * scale

            # Phase 2: normalize + LeakyReLU, row tiles independent -> parallel.
            out = pl.pallas_call(
                functools.partial(_bn_act_kernel, use_act=use_act),
                out_shape=jax.ShapeDtypeStruct((rows_p, Cp), out_dtype),
                grid=(g,),
                in_specs=[pl.BlockSpec((tile, Cp), lambda i: (i, 0)),
                          v_spec, v_spec],
                out_specs=o_spec,
                compiler_params=pltpu.CompilerParams(
                    dimension_semantics=("parallel",),
                    vmem_limit_bytes=_VMEM_LIMIT),
            )(y, scale, shift)

    out = out[:rows, :Cout].reshape(N, Ho, Wo, Cout)
    return out


# --------------------------------------------------------------------------
# Module: parameters + forward
# --------------------------------------------------------------------------

def init_params(key, input_nc, ndf=8, n_layers=3):
    """Deterministic synthetic parameters, shapes as in NLayerDiscriminator.

    norm_layer == nn.BatchNorm2d  =>  use_bias=False for the inner convs.
    """
    kw = 4
    specs = []  # (cin, cout, stride, use_bn, use_act, use_bias)
    specs.append((input_nc, ndf, 2, False, True, True))
    nf_mult = 1
    for n in range(1, n_layers):
        nf_mult_prev = nf_mult
        nf_mult = min(2 ** n, 8)
        specs.append((ndf * nf_mult_prev, ndf * nf_mult, 2, True, True, False))
    nf_mult_prev = nf_mult
    nf_mult = min(2 ** n_layers, 8)
    specs.append((ndf * nf_mult_prev, ndf * nf_mult, 1, True, True, False))
    specs.append((ndf * nf_mult, 1, 1, False, False, True))

    params = []
    for (cin, cout, stride, use_bn, use_act, use_bias) in specs:
        key, k1, k2 = jax.random.split(key, 3)
        w = 0.02 * jax.random.normal(k1, (cout, cin, kw, kw), jnp.float32)
        if use_bias:
            b = 0.01 * jax.random.normal(k2, (cout,), jnp.float32)
        else:
            b = jnp.zeros((cout,), jnp.float32)
        gamma = jnp.ones((cout,), jnp.float32)
        beta = jnp.zeros((cout,), jnp.float32)
        params.append(dict(w=w, b=b, gamma=gamma, beta=beta, stride=stride,
                           use_bn=use_bn, use_act=use_act))
    return params


def nlayer_discriminator(x_nchw, params, row_tile=1024):
    """NCHW in / NCHW out at the module boundary; NHWC + bf16 internally."""
    x = x_nchw.transpose(0, 2, 3, 1)            # -> NHWC once
    n = len(params)
    for li, p in enumerate(params):
        last = (li == n - 1)
        x = conv_block(x, p["w"], p["b"], p["gamma"], p["beta"],
                       stride=p["stride"], pad=1,
                       use_bn=p["use_bn"], use_act=p["use_act"],
                       row_tile=row_tile,
                       out_dtype=jnp.float32 if last else jnp.bfloat16)
    return x.transpose(0, 3, 1, 2)              # -> NCHW once


if __name__ == "__main__":
    key = jax.random.PRNGKey(0)
    k_in, k_par = jax.random.split(key)

    # Small shapes: batch=2, input_nc=4, spatial=32 (the two trailing stride-1
    # k=4 convs require >=32 input for a valid output), ndf=8, n_layers=3.
    B, C_IN, H, W = 2, 4, 32, 32
    x = jax.random.normal(k_in, (B, C_IN, H, W), jnp.float32)
    params = init_params(k_par, input_nc=C_IN, ndf=8, n_layers=3)

    # row_tile=64 so the tiled/pipelined paths (parallel GEMM + two-phase BN)
    # are actually exercised at these toy shapes; default 1024 for real sizes.
    fwd = jax.jit(lambda xx: nlayer_discriminator(xx, params, row_tile=64))
    out = fwd(x)
    jax.block_until_ready(out)

    # PatchGAN map: 32 -> 16 -> 8 -> 4 -> 3 -> 2 spatially, 1 output channel.
    assert out.shape == (B, 1, 2, 2), out.shape
    assert jnp.all(jnp.isfinite(out))
    print("KERNEL_OK")
</pallas_src>

<mosaic_0001>
module attributes {stable_mosaic.version = 11 : i64} {
  func.func @_gemm_bias_act_kernel(%arg0: i32, %arg1: memref<64x64xbf16, #tpu.memory_space<vmem>>, %arg2: memref<64x128xbf16, #tpu.memory_space<vmem>>, %arg3: memref<1x128xf32, #tpu.memory_space<vmem>>, %arg4: memref<64x128xbf16, #tpu.memory_space<vmem>>) attributes {dimension_semantics = [#tpu.dimension_semantics<parallel>], iteration_bounds = array<i64: 8>, scalar_prefetch = 0 : i64, scratch_operands = 0 : i64, tpu.core_type = #tpu.core_type<tc>, window_params = [{transform_indices = @transform_0, window_bounds = array<i64: 64, 64>}, {pipeline_mode = #tpu.pipeline_mode<synchronous>, transform_indices = @transform_1, window_bounds = array<i64: 64, 128>}, {pipeline_mode = #tpu.pipeline_mode<synchronous>, transform_indices = @transform_2, window_bounds = array<i64: 1, 128>}, {transform_indices = @transform_3, window_bounds = array<i64: 64, 128>}]} {
    %c0 = arith.constant 0 : index
    %c0_0 = arith.constant 0 : index
    %0 = vector.load %arg1[%c0, %c0_0] : memref<64x64xbf16, #tpu.memory_space<vmem>>, vector<64x64xbf16>
    %c0_1 = arith.constant 0 : index
    %c0_2 = arith.constant 0 : index
    %1 = vector.load %arg2[%c0_1, %c0_2] : memref<64x128xbf16, #tpu.memory_space<vmem>>, vector<64x128xbf16>
    %cst = arith.constant dense<0.000000e+00> : vector<64x128xf32>
    %2 = tpu.matmul %0, %1, %cst {dimension_numbers = #tpu.dot_dimension_numbers<[1], [0], [0], [1], [0, 0, 1, 1], [], []>} : vector<64x64xbf16>, vector<64x128xbf16>, vector<64x128xf32> -> vector<64x128xf32>
    %c0_3 = arith.constant 0 : index
    %c0_4 = arith.constant 0 : index
    %3 = vector.load %arg3[%c0_3, %c0_4] : memref<1x128xf32, #tpu.memory_space<vmem>>, vector<1x128xf32>
    %4 = vector.broadcast %3 : vector<1x128xf32> to vector<64x128xf32>
    %5 = arith.addf %2, %4 : vector<64x128xf32>
    %cst_5 = arith.constant 0.000000e+00 : f32
    %6 = vector.broadcast %cst_5 : f32 to vector<64x128xf32>
    %7 = arith.cmpf ogt, %5, %6 : vector<64x128xf32>
    %cst_6 = arith.constant 2.000000e-01 : f32
    %8 = vector.broadcast %cst_6 : f32 to vector<64x128xf32>
    %9 = arith.mulf %8, %5 : vector<64x128xf32>
    %10 = arith.select %7, %5, %9 : vector<64x128xi1>, vector<64x128xf32>
    %11 = arith.truncf %10 : vector<64x128xf32> to vector<64x128xbf16>
    %c0_7 = arith.constant 0 : index
    %c0_8 = arith.constant 0 : index
    %12 = vector.load %arg4[%c0_7, %c0_8] : memref<64x128xbf16, #tpu.memory_space<vmem>>, vector<64x128xbf16>
    tpu.vector_store %arg4[%c0_7, %c0_8], %11 {strides = array<i32>} : memref<64x128xbf16, #tpu.memory_space<vmem>>, vector<64x128xbf16>,
    return
  }
  func.func @transform_0(%arg0: i32) -> (i32, i32) {
    %c0_i32 = arith.constant 0 : i32
    %c0_i32_0 = arith.constant 0 : i32
    return %arg0, %c0_i32 : i32, i32
  }
  func.func @transform_1(%arg0: i32) -> (i32, i32) {
    %c0_i32 = arith.constant 0 : i32
    %c0_i32_0 = arith.constant 0 : i32
    %c0_i32_1 = arith.constant 0 : i32
    return %c0_i32, %c0_i32_0 : i32, i32
  }
  func.func @transform_2(%arg0: i32) -> (i32, i32) {
    %c0_i32 = arith.constant 0 : i32
    %c0_i32_0 = arith.constant 0 : i32
    %c0_i32_1 = arith.constant 0 : i32
    return %c0_i32, %c0_i32_0 : i32, i32
  }
  func.func @transform_3(%arg0: i32) -> (i32, i32) {
    %c0_i32 = arith.constant 0 : i32
    %c0_i32_0 = arith.constant 0 : i32
    return %arg0, %c0_i32 : i32, i32
  }
}

module attributes {stable_mosaic.version = 11 : i64} {
  func.func @_gemm_stats_kernel(%arg0: i32, %arg1: memref<64x128xbf16, #tpu.memory_space<vmem>>, %arg2: memref<128x128xbf16, #tpu.memory_space<vmem>>, %arg3: memref<64x128xf32, #tpu.memory_space<vmem>>, %arg4: memref<1x128xf32, #tpu.memory_space<vmem>>, %arg5: memref<1x128xf32, #tpu.memory_space<vmem>>) attributes {dimension_semantics = [#tpu.dimension_semantics<arbitrary>], iteration_bounds = array<i64: 2>, scalar_prefetch = 0 : i64, scratch_operands = 0 : i64, tpu.core_type = #tpu.core_type<tc>, window_params = [{transform_indices = @transform_0, window_bounds = array<i64: 64, 128>}, {pipeline_mode = #tpu.pipeline_mode<synchronous>, transform_indices = @transform_1, window_bounds = array<i64: 128, 128>}, {transform_indices = @transform_2, window_bounds = array<i64: 64, 128>}, {pipeline_mode = #tpu.pipeline_mode<synchronous>, transform_indices = @transform_3, window_bounds = array<i64: 1, 128>}, {pipeline_mode = #tpu.pipeline_mode<synchronous>, transform_indices = @transform_4, window_bounds = array<i64: 1, 128>}]} {
    %c0 = arith.constant 0 : index
    %c0_0 = arith.constant 0 : index
    %0 = vector.load %arg1[%c0, %c0_0] : memref<64x128xbf16, #tpu.memory_space<vmem>>, vector<64x128xbf16>
    %c0_1 = arith.constant 0 : index
    %c0_2 = arith.constant 0 : index
    %1 = vector.load %arg2[%c0_1, %c0_2] : memref<128x128xbf16, #tpu.memory_space<vmem>>, vector<128x128xbf16>
    %cst = arith.constant dense<0.000000e+00> : vector<64x128xf32>
    %2 = tpu.matmul %0, %1, %cst {dimension_numbers = #tpu.dot_dimension_numbers<[1], [0], [0], [1], [0, 0, 1, 1], [], []>} : vector<64x128xbf16>, vector<128x128xbf16>, vector<64x128xf32> -> vector<64x128xf32>
    %c0_3 = arith.constant 0 : index
    %c0_4 = arith.constant 0 : index
    %3 = vector.load %arg3[%c0_3, %c0_4] : memref<64x128xf32, #tpu.memory_space<vmem>>, vector<64x128xf32>
    tpu.vector_store %arg3[%c0_3, %c0_4], %2 {strides = array<i32>} : memref<64x128xf32, #tpu.memory_space<vmem>>, vector<64x128xf32>,
    %c0_i32 = arith.constant 0 : i32
    %4 = arith.cmpi eq, %arg0, %c0_i32 : i32
    %5 = arith.extui %4 : i1 to i32
    %c0_i32_5 = arith.constant 0 : i32
    %6 = arith.cmpi ne, %5, %c0_i32_5 : i32
    scf.if %6 {
      %cst_16 = arith.constant 0.000000e+00 : f32
      %18 = vector.broadcast %cst_16 : f32 to vector<1x128xf32>
      %c0_17 = arith.constant 0 : index
      %c0_18 = arith.constant 0 : index
      %19 = vector.load %arg4[%c0_17, %c0_18] : memref<1x128xf32, #tpu.memory_space<vmem>>, vector<1x128xf32>
      tpu.vector_store %arg4[%c0_17, %c0_18], %18 {strides = array<i32>} : memref<1x128xf32, #tpu.memory_space<vmem>>, vector<1x128xf32>,
      %cst_19 = arith.constant 0.000000e+00 : f32
      %20 = vector.broadcast %cst_19 : f32 to vector<1x128xf32>
      %c0_20 = arith.constant 0 : index
      %c0_21 = arith.constant 0 : index
      %21 = vector.load %arg5[%c0_20, %c0_21] : memref<1x128xf32, #tpu.memory_space<vmem>>, vector<1x128xf32>
      tpu.vector_store %arg5[%c0_20, %c0_21], %20 {strides = array<i32>} : memref<1x128xf32, #tpu.memory_space<vmem>>, vector<1x128xf32>,
    } else {
    }
    %c0_6 = arith.constant 0 : index
    %c0_7 = arith.constant 0 : index
    %7 = vector.load %arg4[%c0_6, %c0_7] : memref<1x128xf32, #tpu.memory_space<vmem>>, vector<1x128xf32>
    %cst_8 = arith.constant dense<0.000000e+00> : vector<128xf32>
    %8 = vector.multi_reduction <add>, %2, %cst_8 [0] : vector<64x128xf32> to vector<128xf32>
    %9 = vector.shape_cast %8 : vector<128xf32> to vector<1x128xf32>
    %10 = arith.addf %7, %9 : vector<1x128xf32>
    %c0_9 = arith.constant 0 : index
    %c0_10 = arith.constant 0 : index
    %11 = vector.load %arg4[%c0_9, %c0_10] : memref<1x128xf32, #tpu.memory_space<vmem>>, vector<1x128xf32>
    tpu.vector_store %arg4[%c0_9, %c0_10], %10 {strides = array<i32>} : memref<1x128xf32, #tpu.memory_space<vmem>>, vector<1x128xf32>,
    %c0_11 = arith.constant 0 : index
    %c0_12 = arith.constant 0 : index
    %12 = vector.load %arg5[%c0_11, %c0_12] : memref<1x128xf32, #tpu.memory_space<vmem>>, vector<1x128xf32>
    %13 = arith.mulf %2, %2 : vector<64x128xf32>
    %cst_13 = arith.constant dense<0.000000e+00> : vector<128xf32>
    %14 = vector.multi_reduction <add>, %13, %cst_13 [0] : vector<64x128xf32> to vector<128xf32>
    %15 = vector.shape_cast %14 : vector<128xf32> to vector<1x128xf32>
    %16 = arith.addf %12, %15 : vector<1x128xf32>
    %c0_14 = arith.constant 0 : index
    %c0_15 = arith.constant 0 : index
    %17 = vector.load %arg5[%c0_14, %c0_15] : memref<1x128xf32, #tpu.memory_space<vmem>>, vector<1x128xf32>
    tpu.vector_store %arg5[%c0_14, %c0_15], %16 {strides = array<i32>} : memref<1x128xf32, #tpu.memory_space<vmem>>, vector<1x128xf32>,
    return
  }
  func.func @transform_0(%arg0: i32) -> (i32, i32) {
    %c0_i32 = arith.constant 0 : i32
    %c0_i32_0 = arith.constant 0 : i32
    return %arg0, %c0_i32 : i32, i32
  }
  func.func @transform_1(%arg0: i32) -> (i32, i32) {
    %c0_i32 = arith.constant 0 : i32
    %c0_i32_0 = arith.constant 0 : i32
    %c0_i32_1 = arith.constant 0 : i32
    return %c0_i32, %c0_i32_0 : i32, i32
  }
  func.func @transform_2(%arg0: i32) -> (i32, i32) {
    %c0_i32 = arith.constant 0 : i32
    %c0_i32_0 = arith.constant 0 : i32
    return %arg0, %c0_i32 : i32, i32
  }
  func.func @transform_3(%arg0: i32) -> (i32, i32) {
    %c0_i32 = arith.constant 0 : i32
    %c0_i32_0 = arith.constant 0 : i32
    %c0_i32_1 = arith.constant 0 : i32
    return %c0_i32, %c0_i32_0 : i32, i32
  }
  func.func @transform_4(%arg0: i32) -> (i32, i32) {
    %c0_i32 = arith.constant 0 : i32
    %c0_i32_0 = arith.constant 0 : i32
    %c0_i32_1 = arith.constant 0 : i32
    return %c0_i32, %c0_i32_0 : i32, i32
  }
}

module attributes {stable_mosaic.version = 11 : i64} {
  func.func @_bn_act_kernel(%arg0: i32, %arg1: memref<64x128xf32, #tpu.memory_space<vmem>>, %arg2: memref<1x128xf32, #tpu.memory_space<vmem>>, %arg3: memref<1x128xf32, #tpu.memory_space<vmem>>, %arg4: memref<64x128xbf16, #tpu.memory_space<vmem>>) attributes {dimension_semantics = [#tpu.dimension_semantics<parallel>], iteration_bounds = array<i64: 2>, scalar_prefetch = 0 : i64, scratch_operands = 0 : i64, tpu.core_type = #tpu.core_type<tc>, window_params = [{transform_indices = @transform_0, window_bounds = array<i64: 64, 128>}, {pipeline_mode = #tpu.pipeline_mode<synchronous>, transform_indices = @transform_1, window_bounds = array<i64: 1, 128>}, {pipeline_mode = #tpu.pipeline_mode<synchronous>, transform_indices = @transform_2, window_bounds = array<i64: 1, 128>}, {transform_indices = @transform_3, window_bounds = array<i64: 64, 128>}]} {
    %c0 = arith.constant 0 : index
    %c0_0 = arith.constant 0 : index
    %0 = vector.load %arg1[%c0, %c0_0] : memref<64x128xf32, #tpu.memory_space<vmem>>, vector<64x128xf32>
    %c0_1 = arith.constant 0 : index
    %c0_2 = arith.constant 0 : index
    %1 = vector.load %arg2[%c0_1, %c0_2] : memref<1x128xf32, #tpu.memory_space<vmem>>, vector<1x128xf32>
    %2 = vector.broadcast %1 : vector<1x128xf32> to vector<64x128xf32>
    %3 = arith.mulf %0, %2 : vector<64x128xf32>
    %c0_3 = arith.constant 0 : index
    %c0_4 = arith.constant 0 : index
    %4 = vector.load %arg3[%c0_3, %c0_4] : memref<1x128xf32, #tpu.memory_space<vmem>>, vector<1x128xf32>
    %5 = vector.broadcast %4 : vector<1x128xf32> to vector<64x128xf32>
    %6 = arith.addf %3, %5 : vector<64x128xf32>
    %cst = arith.constant 0.000000e+00 : f32
    %7 = vector.broadcast %cst : f32 to vector<64x128xf32>
    %8 = arith.cmpf ogt, %6, %7 : vector<64x128xf32>
    %cst_5 = arith.constant 2.000000e-01 : f32
    %9 = vector.broadcast %cst_5 : f32 to vector<64x128xf32>
    %10 = arith.mulf %9, %6 : vector<64x128xf32>
    %11 = arith.select %8, %6, %10 : vector<64x128xi1>, vector<64x128xf32>
    %12 = arith.truncf %11 : vector<64x128xf32> to vector<64x128xbf16>
    %c0_6 = arith.constant 0 : index
    %c0_7 = arith.constant 0 : index
    %13 = vector.load %arg4[%c0_6, %c0_7] : memref<64x128xbf16, #tpu.memory_space<vmem>>, vector<64x128xbf16>
    tpu.vector_store %arg4[%c0_6, %c0_7], %12 {strides = array<i32>} : memref<64x128xbf16, #tpu.memory_space<vmem>>, vector<64x128xbf16>,
    return
  }
  func.func @transform_0(%arg0: i32) -> (i32, i32) {
    %c0_i32 = arith.constant 0 : i32
    %c0_i32_0 = arith.constant 0 : i32
    return %arg0, %c0_i32 : i32, i32
  }
  func.func @transform_1(%arg0: i32) -> (i32, i32) {
    %c0_i32 = arith.constant 0 : i32
    %c0_i32_0 = arith.constant 0 : i32
    %c0_i32_1 = arith.constant 0 : i32
    return %c0_i32, %c0_i32_0 : i32, i32
  }
  func.func @transform_2(%arg0: i32) -> (i32, i32) {
    %c0_i32 = arith.constant 0 : i32
    %c0_i32_0 = arith.constant 0 : i32
    %c0_i32_1 = arith.constant 0 : i32
    return %c0_i32, %c0_i32_0 : i32, i32
  }
  func.func @transform_3(%arg0: i32) -> (i32, i32) {
    %c0_i32 = arith.constant 0 : i32
    %c0_i32_0 = arith.constant 0 : i32
    return %arg0, %c0_i32 : i32, i32
  }
}

module attributes {stable_mosaic.version = 11 : i64} {
  func.func @_gemm_bn_act_fused_kernel(%arg0: memref<32x256xbf16, #tpu.memory_space<vmem>>, %arg1: memref<256x128xbf16, #tpu.memory_space<vmem>>, %arg2: memref<1x128xf32, #tpu.memory_space<vmem>>, %arg3: memref<1x128xf32, #tpu.memory_space<vmem>>, %arg4: memref<32x128xbf16, #tpu.memory_space<vmem>>) attributes {dimension_semantics = [], scalar_prefetch = 0 : i64, scratch_operands = 0 : i64, tpu.core_type = #tpu.core_type<tc>} {
    %c0 = arith.constant 0 : index
    %c0_0 = arith.constant 0 : index
    %0 = vector.load %arg0[%c0, %c0_0] : memref<32x256xbf16, #tpu.memory_space<vmem>>, vector<32x256xbf16>
    %c0_1 = arith.constant 0 : index
    %c0_2 = arith.constant 0 : index
    %1 = vector.load %arg1[%c0_1, %c0_2] : memref<256x128xbf16, #tpu.memory_space<vmem>>, vector<256x128xbf16>
    %cst = arith.constant dense<0.000000e+00> : vector<32x128xf32>
    %2 = tpu.matmul %0, %1, %cst {dimension_numbers = #tpu.dot_dimension_numbers<[1], [0], [0], [1], [0, 0, 1, 1], [], []>} : vector<32x256xbf16>, vector<256x128xbf16>, vector<32x128xf32> -> vector<32x128xf32>
    %cst_3 = arith.constant dense<0.000000e+00> : vector<128xf32>
    %3 = vector.multi_reduction <add>, %2, %cst_3 [0] : vector<32x128xf32> to vector<128xf32>
    %4 = vector.shape_cast %3 : vector<128xf32> to vector<1x128xf32>
    %cst_4 = arith.constant 3.200000e+01 : f32
    %5 = vector.broadcast %cst_4 : f32 to vector<1x128xf32>
    %6 = arith.divf %4, %5 : vector<1x128xf32>
    %7 = vector.broadcast %6 : vector<1x128xf32> to vector<32x128xf32>
    %8 = arith.subf %2, %7 : vector<32x128xf32>
    %9 = arith.mulf %8, %8 : vector<32x128xf32>
    %cst_5 = arith.constant dense<0.000000e+00> : vector<128xf32>
    %10 = vector.multi_reduction <add>, %9, %cst_5 [0] : vector<32x128xf32> to vector<128xf32>
    %11 = vector.shape_cast %10 : vector<128xf32> to vector<1x128xf32>
    %cst_6 = arith.constant 3.200000e+01 : f32
    %12 = vector.broadcast %cst_6 : f32 to vector<1x128xf32>
    %13 = arith.divf %11, %12 : vector<1x128xf32>
    %14 = vector.broadcast %6 : vector<1x128xf32> to vector<32x128xf32>
    %15 = arith.subf %2, %14 : vector<32x128xf32>
    %cst_7 = arith.constant 9.99999974E-6 : f32
    %16 = vector.broadcast %cst_7 : f32 to vector<1x128xf32>
    %17 = arith.addf %13, %16 : vector<1x128xf32>
    %18 = math.rsqrt %17 : vector<1x128xf32>
    %19 = vector.broadcast %18 : vector<1x128xf32> to vector<32x128xf32>
    %20 = arith.mulf %15, %19 : vector<32x128xf32>
    %c0_8 = arith.constant 0 : index
    %c0_9 = arith.constant 0 : index
    %21 = vector.load %arg2[%c0_8, %c0_9] : memref<1x128xf32, #tpu.memory_space<vmem>>, vector<1x128xf32>
    %22 = vector.broadcast %21 : vector<1x128xf32> to vector<32x128xf32>
    %23 = arith.mulf %20, %22 : vector<32x128xf32>
    %c0_10 = arith.constant 0 : index
    %c0_11 = arith.constant 0 : index
    %24 = vector.load %arg3[%c0_10, %c0_11] : memref<1x128xf32, #tpu.memory_space<vmem>>, vector<1x128xf32>
    %25 = vector.broadcast %24 : vector<1x128xf32> to vector<32x128xf32>
    %26 = arith.addf %23, %25 : vector<32x128xf32>
    %cst_12 = arith.constant 0.000000e+00 : f32
    %27 = vector.broadcast %cst_12 : f32 to vector<32x128xf32>
    %28 = arith.cmpf ogt, %26, %27 : vector<32x128xf32>
    %cst_13 = arith.constant 2.000000e-01 : f32
    %29 = vector.broadcast %cst_13 : f32 to vector<32x128xf32>
    %30 = arith.mulf %29, %26 : vector<32x128xf32>
    %31 = arith.select %28, %26, %30 : vector<32x128xi1>, vector<32x128xf32>
    %32 = arith.truncf %31 : vector<32x128xf32> to vector<32x128xbf16>
    %c0_14 = arith.constant 0 : index
    %c0_15 = arith.constant 0 : index
    %33 = vector.load %arg4[%c0_14, %c0_15] : memref<32x128xbf16, #tpu.memory_space<vmem>>, vector<32x128xbf16>
    tpu.vector_store %arg4[%c0_14, %c0_15], %32 {strides = array<i32>} : memref<32x128xbf16, #tpu.memory_space<vmem>>, vector<32x128xbf16>,
    return
  }
}

module attributes {stable_mosaic.version = 11 : i64} {
  func.func @_gemm_bn_act_fused_kernel(%arg0: memref<18x512xbf16, #tpu.memory_space<vmem>>, %arg1: memref<512x128xbf16, #tpu.memory_space<vmem>>, %arg2: memref<1x128xf32, #tpu.memory_space<vmem>>, %arg3: memref<1x128xf32, #tpu.memory_space<vmem>>, %arg4: memref<18x128xbf16, #tpu.memory_space<vmem>>) attributes {dimension_semantics = [], scalar_prefetch = 0 : i64, scratch_operands = 0 : i64, tpu.core_type = #tpu.core_type<tc>} {
    %c0 = arith.constant 0 : index
    %c0_0 = arith.constant 0 : index
    %0 = vector.load %arg0[%c0, %c0_0] : memref<18x512xbf16, #tpu.memory_space<vmem>>, vector<18x512xbf16>
    %c0_1 = arith.constant 0 : index
    %c0_2 = arith.constant 0 : index
    %1 = vector.load %arg1[%c0_1, %c0_2] : memref<512x128xbf16, #tpu.memory_space<vmem>>, vector<512x128xbf16>
    %cst = arith.constant dense<0.000000e+00> : vector<18x128xf32>
    %2 = tpu.matmul %0, %1, %cst {dimension_numbers = #tpu.dot_dimension_numbers<[1], [0], [0], [1], [0, 0, 1, 1], [], []>} : vector<18x512xbf16>, vector<512x128xbf16>, vector<18x128xf32> -> vector<18x128xf32>
    %cst_3 = arith.constant dense<0.000000e+00> : vector<128xf32>
    %3 = vector.multi_reduction <add>, %2, %cst_3 [0] : vector<18x128xf32> to vector<128xf32>
    %4 = vector.shape_cast %3 : vector<128xf32> to vector<1x128xf32>
    %cst_4 = arith.constant 1.800000e+01 : f32
    %5 = vector.broadcast %cst_4 : f32 to vector<1x128xf32>
    %6 = arith.divf %4, %5 : vector<1x128xf32>
    %7 = vector.broadcast %6 : vector<1x128xf32> to vector<18x128xf32>
    %8 = arith.subf %2, %7 : vector<18x128xf32>
    %9 = arith.mulf %8, %8 : vector<18x128xf32>
    %cst_5 = arith.constant dense<0.000000e+00> : vector<128xf32>
    %10 = vector.multi_reduction <add>, %9, %cst_5 [0] : vector<18x128xf32> to vector<128xf32>
    %11 = vector.shape_cast %10 : vector<128xf32> to vector<1x128xf32>
    %cst_6 = arith.constant 1.800000e+01 : f32
    %12 = vector.broadcast %cst_6 : f32 to vector<1x128xf32>
    %13 = arith.divf %11, %12 : vector<1x128xf32>
    %14 = vector.broadcast %6 : vector<1x128xf32> to vector<18x128xf32>
    %15 = arith.subf %2, %14 : vector<18x128xf32>
    %cst_7 = arith.constant 9.99999974E-6 : f32
    %16 = vector.broadcast %cst_7 : f32 to vector<1x128xf32>
    %17 = arith.addf %13, %16 : vector<1x128xf32>
    %18 = math.rsqrt %17 : vector<1x128xf32>
    %19 = vector.broadcast %18 : vector<1x128xf32> to vector<18x128xf32>
    %20 = arith.mulf %15, %19 : vector<18x128xf32>
    %c0_8 = arith.constant 0 : index
    %c0_9 = arith.constant 0 : index
    %21 = vector.load %arg2[%c0_8, %c0_9] : memref<1x128xf32, #tpu.memory_space<vmem>>, vector<1x128xf32>
    %22 = vector.broadcast %21 : vector<1x128xf32> to vector<18x128xf32>
    %23 = arith.mulf %20, %22 : vector<18x128xf32>
    %c0_10 = arith.constant 0 : index
    %c0_11 = arith.constant 0 : index
    %24 = vector.load %arg3[%c0_10, %c0_11] : memref<1x128xf32, #tpu.memory_space<vmem>>, vector<1x128xf32>
    %25 = vector.broadcast %24 : vector<1x128xf32> to vector<18x128xf32>
    %26 = arith.addf %23, %25 : vector<18x128xf32>
    %cst_12 = arith.constant 0.000000e+00 : f32
    %27 = vector.broadcast %cst_12 : f32 to vector<18x128xf32>
    %28 = arith.cmpf ogt, %26, %27 : vector<18x128xf32>
    %cst_13 = arith.constant 2.000000e-01 : f32
    %29 = vector.broadcast %cst_13 : f32 to vector<18x128xf32>
    %30 = arith.mulf %29, %26 : vector<18x128xf32>
    %31 = arith.select %28, %26, %30 : vector<18x128xi1>, vector<18x128xf32>
    %32 = arith.truncf %31 : vector<18x128xf32> to vector<18x128xbf16>
    %c0_14 = arith.constant 0 : index
    %c0_15 = arith.constant 0 : index
    %33 = vector.load %arg4[%c0_14, %c0_15] : memref<18x128xbf16, #tpu.memory_space<vmem>>, vector<18x128xbf16>
    tpu.vector_store %arg4[%c0_14, %c0_15], %32 {strides = array<i32>} : memref<18x128xbf16, #tpu.memory_space<vmem>>, vector<18x128xbf16>,
    return
  }
}

module attributes {stable_mosaic.version = 11 : i64} {
  func.func @_gemm_bias_act_kernel(%arg0: memref<8x1024xbf16, #tpu.memory_space<vmem>>, %arg1: memref<1024x128xbf16, #tpu.memory_space<vmem>>, %arg2: memref<1x128xf32, #tpu.memory_space<vmem>>, %arg3: memref<8x128xf32, #tpu.memory_space<vmem>>) attributes {dimension_semantics = [], scalar_prefetch = 0 : i64, scratch_operands = 0 : i64, tpu.core_type = #tpu.core_type<tc>} {
    %c0 = arith.constant 0 : index
    %c0_0 = arith.constant 0 : index
    %0 = vector.load %arg0[%c0, %c0_0] : memref<8x1024xbf16, #tpu.memory_space<vmem>>, vector<8x1024xbf16>
    %c0_1 = arith.constant 0 : index
    %c0_2 = arith.constant 0 : index
    %1 = vector.load %arg1[%c0_1, %c0_2] : memref<1024x128xbf16, #tpu.memory_space<vmem>>, vector<1024x128xbf16>
    %cst = arith.constant dense<0.000000e+00> : vector<8x128xf32>
    %2 = tpu.matmul %0, %1, %cst {dimension_numbers = #tpu.dot_dimension_numbers<[1], [0], [0], [1], [0, 0, 1, 1], [], []>} : vector<8x1024xbf16>, vector<1024x128xbf16>, vector<8x128xf32> -> vector<8x128xf32>
    %c0_3 = arith.constant 0 : index
    %c0_4 = arith.constant 0 : index
    %3 = vector.load %arg2[%c0_3, %c0_4] : memref<1x128xf32, #tpu.memory_space<vmem>>, vector<1x128xf32>
    %4 = vector.broadcast %3 : vector<1x128xf32> to vector<8x128xf32>
    %5 = arith.addf %2, %4 : vector<8x128xf32>
    %c0_5 = arith.constant 0 : index
    %c0_6 = arith.constant 0 : index
    %6 = vector.load %arg3[%c0_5, %c0_6] : memref<8x128xf32, #tpu.memory_space<vmem>>, vector<8x128xf32>
    tpu.vector_store %arg3[%c0_5, %c0_6], %5 {strides = array<i32>} : memref<8x128xf32, #tpu.memory_space<vmem>>, vector<8x128xf32>,
    return
  }
}

</mosaic_0001>

<bundles_post_ra>
// kernel: _lambda_.6
= control target key start
LH: loop header
LB: loop body
LE: loop exit
PB: predicated region body
PF: predicated region fallthrough
CT: control target
= control target key end

     0   :  { %s579_s12 = smov 0   ;;  %s624_s0 = inlined_call_operand.vmem [shape: bf16[512,64], index: 0, kind: input, shape index: {}]   ;;  %s625_s1 = inlined_call_operand.vmem [shape: bf16[64,128], index: 1, kind: input, shape index: {}]   ;;  %s626_s2 = inlined_call_operand.vmem [shape: f32[1,128], index: 2, kind: input, shape index: {}]   ;;  %s627_s3 = inlined_call_operand.vmem [shape: bf16[512,128], index: 3, kind: output, shape index: {}]  }
   0x1 LB: > { %s440_s13 = sadd.s32 4294967295, %s557_s12   ;;  %p444_p0 = scmp.ge.s32.totalorder %s557_s12, 1  ;;  %s557_s12 = sphi %s579_s12, %s13_s12  }
   0x2   : > { %p138_p1 = scmp.lt.s32.totalorder %s557_s12, 9 }
   0x4   : > { %p139_p2 = pnand %p444_p0, %p138_p1 }
   0x5   : > { %v543_v0 = vld [vmem:[%s625_s1] sm:$0xff] (!%p139_p2)   ;;  %s445_s16 = sshll.u32 (!%p139_p2), %s440_s13, 3  ;;  %v544_v1 = vld [vmem:[%s625_s1 + $0x8] sm:$0xff] (!%p139_p2)   ;;  %v545_v2 = vld [vmem:[%s625_s1 + $0x10] sm:$0xff] (!%p139_p2)   ;;  %vm242_vm0 = vcmask (!%p139_p2), 523264  }
   0x6   : > { %142 = sbr.rel (%p139_p2) target bundleno = 247 (0xf7), region = 32  ;;  %p163_p3 = scmp.lt.s32.totalorder (!%p139_p2), %s445_s16, 63  ;;  %511 = vmatprep.subr.bf16.mxu0 (!%p139_p2), %v543_v0  ;;  %527 = vmatprep.subr.bf16.mxu1 (!%p139_p2), %v543_v0  ;;  %v546_v3 = vld [vmem:[%s625_s1 + $0x18] sm:$0xff] (!%p139_p2)   ;;  %v449_v8 = vld [vmem:[%s626_s2] ss:$0 sm:$0xff] (!%p139_p2) }
   0x7   : > { %512 = vmatpush3.bf16.msra.mxu0 (!%p139_p2), %v543_v0  ;;  %531 = vmatpush3.bf16.msra.mxu1 (!%p139_p2), %v543_v0 }
   0x8   : > { %513 = vmatprep.subr.bf16.mxu0 (!%p139_p2), %v544_v1  ;;  %528 = vmatprep.subr.bf16.mxu1 (!%p139_p2), %v544_v1 }
   0xb   : > { %514 = vmatpush3.bf16.msra.mxu0 (!%p139_p2), %v544_v1  ;;  %532 = vmatpush3.bf16.msra.mxu1 (!%p139_p2), %v544_v1 }
   0xc   : > { %515 = vmatprep.subr.bf16.mxu0 (!%p139_p2), %v545_v2  ;;  %529 = vmatprep.subr.bf16.mxu1 (!%p139_p2), %v545_v2 }
   0xd   : > { %s629_s16 = smov (!%p163_p3, %s445_s16), 63 }
   0xe   : > { %s446_s21 = sshll.u32 %s629_s16, 2 }
   0xf   : > { %s166_s26 = scalar_lea.vmem %s624_s0, %s446_s21  ;;  %516 = vmatpush3.bf16.msra.mxu0 %v545_v2  ;;  %533 = vmatpush3.bf16.msra.mxu1 %v545_v2  ;;  %s172_s4 = scalar_lea.vmem %s627_s3, %s446_s21 }
  0x10   : > { %v547_v4 = vld [vmem:[%s166_s26] sm:$0xff]   ;;  %v548_v5 = vld [vmem:[%s166_s26 + $0x10] sm:$0xff]   ;;  %517 = vmatprep.subr.bf16.mxu0 %v546_v3  ;;  %530 = vmatprep.subr.bf16.mxu1 %v546_v3  ;;  %v549_v6 = vld [vmem:[%s166_s26 + $0x8] sm:$0xff]  }
  0x11   : > { %519 = vmatprep.mubr.msk.bf16.mxu0 %vm242_vm0, %v547_v4  ;;  %523 = vmatprep.mubr.msk.bf16.mxu1 %vm242_vm0, %v548_v5  ;;  %v550_v7 = vld [vmem:[%s166_s26 + $0x18] sm:$0xff]  }
  0x13   : > { %518 = vmatpush3.bf16.msra.mxu0 %v546_v3  ;;  %534 = vmatpush3.bf16.msra.mxu1 %v546_v3 }
  0x16   : > { %520 = vmatmul.mubr.msk.bf16.vlgmr.msra.gmra.mrb[0].mxu0 %vm242_vm0, %v549_v6  ;;  %524 = vmatmul.mubr.msk.bf16.vlgmr.msra.gmra.mrb[0].mxu1 %vm242_vm0, %v550_v7 }
  0xe9   : > { %v521_v9 = vpop.f32.mrb[0].mxu0  ;;  %v525_v10 = vpop.f32.mrb[0].mxu1 }
  0xea   : > { %v298_v11 = vadd.f32 %v521_v9, %v449_v8  ;;  %v314_v12 = vadd.f32 %v525_v10, %v449_v8  ;;  %v289_v13 = vpop.f32.mrb[1].mxu0  ;;  %v305_v14 = vpop.f32.mrb[1].mxu1 }
  0xeb   : > { %v290_v15 = vadd.f32 %v449_v8, %v289_v13  ;;  %v306_v16 = vadd.f32 %v449_v8, %v305_v14  ;;  %v522_v17 = vpop.f32.mrb[2].mxu0  ;;  %v526_v18 = vpop.f32.mrb[2].mxu1 }
  0xec   : > { %vm322_vm1 = vcmp.gt.f32.partialorder %v298_v11, 0.0  ;;  %v330_v19 = vmul.f32 0.2, %v298_v11  ;;  %vm326_vm2 = vcmp.gt.f32.partialorder %v314_v12, 0.0  ;;  %v334_v20 = vmul.f32 0.2, %v314_v12 }
  0xed   : > { %vm320_vm3 = vcmp.gt.f32.partialorder %v290_v15, 0.0  ;;  %v328_v21 = vmul.f32 0.2, %v290_v15  ;;  %vm324_vm4 = vcmp.gt.f32.partialorder %v306_v16, 0.0  ;;  %v332_v22 = vmul.f32 0.2, %v306_v16 }
  0xee   : > { %v301_v23 = vadd.f32 %v522_v17, %v449_v8  ;;  %v317_v24 = vadd.f32 %v526_v18, %v449_v8  ;;  %v292_v25 = vpop.f32.mrb[3].mxu0  ;;  %v308_v26 = vpop.f32.mrb[3].mxu1  ;;  %v338_v27 = vsel %vm322_vm1, %v298_v11, %v330_v19  ;;  %v342_v28 = vsel %vm326_vm2, %v314_v12, %v334_v20 }
  0xef   : > { %v293_v29 = vadd.f32 %v449_v8, %v292_v25  ;;  %v309_v30 = vadd.f32 %v449_v8, %v308_v26  ;;  %v336_v35 = vsel %vm320_vm3, %v290_v15, %v328_v21  ;;  %v340_v36 = vsel %vm324_vm4, %v306_v16, %v332_v22 }
  0xf0   : > { %vm323_vm5 = vcmp.gt.f32.partialorder %v301_v23, 0.0  ;;  %v331_v31 = vmul.f32 0.2, %v301_v23  ;;  %vm327_vm6 = vcmp.gt.f32.partialorder %v317_v24, 0.0  ;;  %v335_v32 = vmul.f32 0.2, %v317_v24 }
  0xf1   : > { %vm321_vm7 = vcmp.gt.f32.partialorder %v293_v29, 0.0  ;;  %v329_v33 = vmul.f32 0.2, %v293_v29  ;;  %vm325_vm8 = vcmp.gt.f32.partialorder %v309_v30, 0.0  ;;  %v333_v34 = vmul.f32 0.2, %v309_v30 }
  0xf2   : > { %v339_v37 = vsel %vm323_vm5, %v301_v23, %v331_v31  ;;  %v343_v38 = vsel %vm327_vm6, %v317_v24, %v335_v32 }
  0xf3   : > { %v488_v39 = vpack.c.bf16 %v339_v37, %v338_v27  ;;  %v498_v40 = vpack.c.bf16 %v343_v38, %v342_v28  ;;  %v337_v41 = vsel %vm321_vm7, %v293_v29, %v329_v33  ;;  %v341_v42 = vsel %vm325_vm8, %v309_v30, %v333_v34 }
  0xf4   : > { %v483_v43 = vpack.c.bf16 %v337_v41, %v336_v35  ;;  %v493_v44 = vpack.c.bf16 %v341_v42, %v340_v36 }
  0xf5   : > { %500 = vst [vmem:[%s172_s4 + $0x8] sm:$0xff] %v488_v39   ;;  %502 = vst [vmem:[%s172_s4 + $0x18] sm:$0xff] %v498_v40  }
  0xf6   : > { %484 = vst [vmem:[%s172_s4] sm:$0xff] %v483_v43   ;;  %501 = vst [vmem:[%s172_s4 + $0x10] sm:$0xff] %v493_v44  }
  0xf7 PF: > { %s13_s12 = sadd.s32 1, %s557_s12  }
  0xf8   : > { %p10_p4 = scmp.ge.s32.totalorder %s13_s12, 10  }
  0xfa   :  { %12 = sbr.rel (!%p10_p4) target bundleno = 1 (0x1), region = 62 }

// kernel: _lambda_.7
= control target key start
LH: loop header
LB: loop body
LE: loop exit
PB: predicated region body
PF: predicated region fallthrough
CT: control target
= control target key end

     0   :  { %s611_s15 = smov 0   ;;  %s684_s0 = inlined_call_operand.vmem [shape: bf16[128,128], index: 0, kind: input, shape index: {}]   ;;  %s685_s1 = inlined_call_operand.vmem [shape: bf16[128,128], index: 1, kind: input, shape index: {}]   ;;  %s686_s2 = inlined_call_operand.vmem [shape: f32[128,128], index: 2, kind: output, shape index: {0}]   ;;  %s687_s3 = inlined_call_operand.vmem [shape: f32[1,128], index: 3, kind: output, shape index: {1}]   ;;  %s688_s4 = inlined_call_operand.vmem [shape: f32[1,128], index: 4, kind: output, shape index: {2}]  }
   0x1 LB: > { %s480_s16 = sadd.s32 4294967295, %s583_s15   ;;  %p484_p0 = scmp.ge.s32.totalorder %s583_s15, 1  ;;  %s583_s15 = sphi %s611_s15, %s15_s15  }
   0x2   : > { %p158_p1 = scmp.lt.s32.totalorder %s583_s15, 3 }
   0x4   : > { %p159_p2 = pnand %p484_p0, %p158_p1 }
   0x5   : > { %v565_v0 = vld [vmem:[%s685_s1] sm:$0xff] (!%p159_p2)   ;;  %s485_s19 = sshll.u32 (!%p159_p2), %s480_s16, 3  ;;  %v566_v1 = vld [vmem:[%s685_s1 + $0x8] sm:$0xff] (!%p159_p2)   ;;  %v567_v2 = vld [vmem:[%s685_s1 + $0x10] sm:$0xff] (!%p159_p2)   ;;  %p501_p4 = scmp.ne.s32.totalorder (!%p159_p2), %s480_s16, 0 }
   0x6   : > { %162 = sbr.rel (%p159_p2) target bundleno = 285 (0x11d), region = 28  ;;  %p185_p3 = scmp.lt.s32.totalorder (!%p159_p2), %s485_s19, 15  ;;  %516 = vmatprep.subr.bf16.mxu0 (!%p159_p2), %v565_v0  ;;  %540 = vmatprep.subr.bf16.mxu1 (!%p159_p2), %v565_v0  ;;  %v568_v3 = vld [vmem:[%s685_s1 + $0x18] sm:$0xff] (!%p159_p2)   ;;  %v569_v6 = vld [vmem:[%s685_s1 + $0x20] sm:$0xff] (!%p159_p2)   ;;  %v570_v7 = vld [vmem:[%s685_s1 + $0x28] sm:$0xff] (!%p159_p2)  }
   0x7   : > { %517 = vmatpush3.bf16.msra.mxu0 (!%p159_p2), %v565_v0  ;;  %548 = vmatpush3.bf16.msra.mxu1 (!%p159_p2), %v565_v0  ;;  %v571_v8 = vld [vmem:[%s685_s1 + $0x30] sm:$0xff] (!%p159_p2)   ;;  %v572_v9 = vld [vmem:[%s685_s1 + $0x38] sm:$0xff] (!%p159_p2)  }
   0x8   : > { %518 = vmatprep.subr.bf16.mxu0 (!%p159_p2), %v566_v1  ;;  %541 = vmatprep.subr.bf16.mxu1 (!%p159_p2), %v566_v1 }
   0xb   : > { %519 = vmatpush3.bf16.msra.mxu0 (!%p159_p2), %v566_v1  ;;  %549 = vmatpush3.bf16.msra.mxu1 (!%p159_p2), %v566_v1 }
   0xc   : > { %520 = vmatprep.subr.bf16.mxu0 (!%p159_p2), %v567_v2  ;;  %542 = vmatprep.subr.bf16.mxu1 (!%p159_p2), %v567_v2 }
   0xd   : > { %s690_s19 = smov (!%p185_p3, %s485_s19), 15  ;;  %v585_v20 = vmov (!%p501_p4), 0.0  }
   0xe   : > { %s486_s24 = sshll.u32 %s690_s19, 2  ;;  %s488_s12 = sshll.u32 %s690_s19, 3  ;;  %370 = vst [vmem:[%s687_s3] sm:$0x1] (!%p501_p4), %v585_v20  ;;  %371 = vst [vmem:[%s688_s4] sm:$0x1] (!%p501_p4), %v585_v20 }
   0xf   : > { %s636_s27 = scalar_lea.vmem %s684_s0, %s486_s24  ;;  %521 = vmatpush3.bf16.msra.mxu0 %v567_v2  ;;  %550 = vmatpush3.bf16.msra.mxu1 %v567_v2  ;;  %s194_s17 = scalar_lea.vmem %s686_s2, %s488_s12 }
  0x10   : > { %v573_v4 = vld [vmem:[%s636_s27] sm:$0xff]   ;;  %v574_v5 = vld [vmem:[%s636_s27 + $0x10] sm:$0xff]   ;;  %522 = vmatprep.subr.bf16.mxu0 %v568_v3  ;;  %543 = vmatprep.subr.bf16.mxu1 %v568_v3  ;;  %v575_v10 = vld [vmem:[%s636_s27 + $0x8] sm:$0xff]  }
  0x11   : > { %532 = vmatprep.mubr.bf16.mxu0 %v573_v4  ;;  %536 = vmatprep.mubr.bf16.mxu1 %v574_v5  ;;  %v576_v11 = vld [vmem:[%s636_s27 + $0x18] sm:$0xff]  }
  0x13   : > { %523 = vmatpush3.bf16.msra.mxu0 %v568_v3  ;;  %551 = vmatpush3.bf16.msra.mxu1 %v568_v3 }
  0x14   : > { %524 = vmatprep.subr.bf16.mxu0 %v569_v6  ;;  %544 = vmatprep.subr.bf16.mxu1 %v569_v6 }
  0x17   : > { %525 = vmatpush3.bf16.msra.mxu0 %v569_v6  ;;  %552 = vmatpush3.bf16.msra.mxu1 %v569_v6 }
  0x18   : > { %526 = vmatprep.subr.bf16.mxu0 %v570_v7  ;;  %545 = vmatprep.subr.bf16.mxu1 %v570_v7 }
  0x1b   : > { %527 = vmatpush3.bf16.msra.mxu0 %v570_v7  ;;  %553 = vmatpush3.bf16.msra.mxu1 %v570_v7 }
  0x1c   : > { %528 = vmatprep.subr.bf16.mxu0 %v571_v8  ;;  %546 = vmatprep.subr.bf16.mxu1 %v571_v8 }
  0x1f   : > { %529 = vmatpush3.bf16.msra.mxu0 %v571_v8  ;;  %554 = vmatpush3.bf16.msra.mxu1 %v571_v8 }
  0x20   : > { %530 = vmatprep.subr.bf16.mxu0 %v572_v9  ;;  %547 = vmatprep.subr.bf16.mxu1 %v572_v9 }
  0x23   : > { %531 = vmatpush3.bf16.msra.mxu0 %v572_v9  ;;  %555 = vmatpush3.bf16.msra.mxu1 %v572_v9 }
  0x26   : > { %533 = vmatmul.mubr.bf16.vlgmr.msra.gmra.mrb[0].mxu0 %v575_v10  ;;  %537 = vmatmul.mubr.bf16.vlgmr.msra.gmra.mrb[0].mxu1 %v576_v11 }
  0xf7   : > { %369 = sbr.rel (%p501_p4) target bundleno = 254 (0xfe), region = 32 }
  0xf9   : > { %v534_v12 = vpop.f32.mrb[0].mxu0  ;;  %v538_v13 = vpop.f32.mrb[0].mxu1 }
  0xfa   : > { %360 = vst [vmem:[%s194_s17 + $0x10] sm:$0xff] %v534_v12  ;;  %364 = vst [vmem:[%s194_s17 + $0x30] sm:$0xff] %v538_v13  ;;  %v327_v14 = vpop.f32.mrb[1].mxu0  ;;  %v343_v15 = vpop.f32.mrb[1].mxu1 }
  0xfb   : > { %358 = vst [vmem:[%s194_s17] sm:$0xff] %v327_v14  ;;  %362 = vst [vmem:[%s194_s17 + $0x20] sm:$0xff] %v343_v15  ;;  %v535_v16 = vpop.f32.mrb[2].mxu0  ;;  %v539_v17 = vpop.f32.mrb[2].mxu1 }
  0xfc   : > { %361 = vst [vmem:[%s194_s17 + $0x18] sm:$0xff] %v535_v16  ;;  %365 = vst [vmem:[%s194_s17 + $0x38] sm:$0xff] %v539_v17  ;;  %v330_v18 = vpop.f32.mrb[3].mxu0  ;;  %v346_v19 = vpop.f32.mrb[3].mxu1 }
  0xfd   : > { %359 = vst [vmem:[%s194_s17 + $0x8] sm:$0xff] %v330_v18  ;;  %363 = vst [vmem:[%s194_s17 + $0x28] sm:$0xff] %v346_v19 }
  0xfe PF: > { %v373_v21 = vadd.f32 %v330_v18, %v327_v14  ;;  %v389_v22 = vmul.f32 %v327_v14, %v327_v14  ;;  %v390_v23 = vmul.f32 %v330_v18, %v330_v18  ;;  %v391_v24 = vmul.f32 %v534_v12, %v534_v12  ;;  %v372_v52 = vld [vmem:[%s687_s3] sm:$0x1] }
  0xff   : > { %v392_v26 = vmul.f32 %v535_v16, %v535_v16  ;;  %v393_v29 = vmul.f32 %v343_v15, %v343_v15  ;;  %v394_v32 = vmul.f32 %v346_v19, %v346_v19  ;;  %v395_v35 = vmul.f32 %v538_v13, %v538_v13  ;;  %v388_v55 = vld [vmem:[%s688_s4] sm:$0x1] }
 0x100   : > { %v374_v25 = vadd.f32 %v534_v12, %v373_v21  ;;  %v397_v27 = vadd.f32 %v390_v23, %v389_v22  ;;  %v396_v38 = vmul.f32 %v539_v17, %v539_v17 }
 0x102   : > { %v375_v28 = vadd.f32 %v535_v16, %v374_v25  ;;  %v398_v30 = vadd.f32 %v397_v27, %v391_v24 }
 0x104   : > { %v376_v31 = vadd.f32 %v375_v28, %v343_v15  ;;  %v399_v33 = vadd.f32 %v398_v30, %v392_v26 }
 0x106   : > { %v377_v34 = vadd.f32 %v376_v31, %v346_v19  ;;  %v400_v36 = vadd.f32 %v399_v33, %v393_v29 }
 0x108   : > { %v378_v37 = vadd.f32 %v538_v13, %v377_v34  ;;  %v401_v39 = vadd.f32 %v400_v36, %v394_v32 }
 0x10a   : > { %v379_v40 = vadd.f32 %v539_v17, %v378_v37  ;;  %v402_v41 = vadd.f32 %v401_v39, %v395_v35 }
 0x10c   : > { %v380_v42 = vrot.slane %v379_v40, 4  ;;  %v403_v43 = vadd.f32 %v402_v41, %v396_v38 }
 0x10e   : > { %v381_v44 = vadd.f32 %v380_v42, %v379_v40  ;;  %v404_v45 = vrot.slane %v403_v43, 4 }
 0x110   : > { %v382_v46 = vrot.slane %v381_v44, 2  ;;  %v405_v47 = vadd.f32 %v404_v45, %v403_v43 }
 0x112   : > { %v383_v48 = vadd.f32 %v382_v46, %v381_v44  ;;  %v406_v49 = vrot.slane %v405_v47, 2 }
 0x114   : > { %v384_v50 = vrot.slane %v383_v48, 1  ;;  %v407_v51 = vadd.f32 %v406_v49, %v405_v47 }
 0x116   : > { %v385_v53 = vadd.f32 %v384_v50, %v383_v48  ;;  %v408_v54 = vrot.slane %v407_v51, 1 }
 0x118   : > { %v386_v56 = vadd.f32 %v385_v53, %v372_v52  ;;  %v409_v57 = vadd.f32 %v408_v54, %v407_v51 }
 0x11a   : > { %387 = vst [vmem:[%s687_s3] sm:$0x1] %v386_v56  ;;  %v410_v58 = vadd.f32 %v409_v57, %v388_v55 }
 0x11c   : > { %411 = vst [vmem:[%s688_s4] sm:$0x1] %v410_v58 }
 0x11d PF: > { %s15_s15 = sadd.s32 1, %s583_s15  }
 0x11e   : > { %p12_p5 = scmp.ge.s32.totalorder %s15_s15, 4  }
 0x120   :  { %14 = sbr.rel (!%p12_p5) target bundleno = 1 (0x1), region = 78 }

// kernel: _lambda_.8
= control target key start
LH: loop header
LB: loop body
LE: loop exit
PB: predicated region body
PF: predicated region fallthrough
CT: control target
= control target key end

     0   :  { %s420_s12 = smov 0   ;;  %s447_s0 = inlined_call_operand.vmem [shape: f32[128,128], index: 0, kind: input, shape index: {}]   ;;  %s448_s1 = inlined_call_operand.vmem [shape: f32[1,128], index: 1, kind: input, shape index: {}]   ;;  %s449_s2 = inlined_call_operand.vmem [shape: f32[1,128], index: 2, kind: input, shape index: {}]   ;;  %s450_s3 = inlined_call_operand.vmem [shape: bf16[128,128], index: 3, kind: output, shape index: {}]  }
   0x1 LB: > { %s332_s13 = sadd.s32 4294967295, %s398_s12   ;;  %p336_p0 = scmp.ge.s32.totalorder %s398_s12, 1  ;;  %s398_s12 = sphi %s420_s12, %s13_s12  }
   0x2   : > { %p138_p1 = scmp.lt.s32.totalorder %s398_s12, 3 }
   0x4   : > { %p139_p2 = pnand %p336_p0, %p138_p1 }
   0x5   : > { %s337_s14 = sshll.u32 (!%p139_p2), %s332_s13, 3  ;;  %v341_v0 = vld [vmem:[%s448_s1] ss:$0 sm:$0xff] (!%p139_p2) }
   0x6   : > { %142 = sbr.rel (%p139_p2) target bundleno = 34 (0x22), region = 32  ;;  %p163_p3 = scmp.lt.s32.totalorder (!%p139_p2), %s337_s14, 15  ;;  %v342_v1 = vld [vmem:[%s449_s2] ss:$0 sm:$0xff] (!%p139_p2) }
   0xd   : > { %s452_s14 = smov (!%p163_p3, %s337_s14), 15 }
   0xe   : > { %s338_s15 = sshll.u32 %s452_s14, 3  ;;  %s340_s23 = sshll.u32 %s452_s14, 2 }
   0xf   : > { %s166_s20 = scalar_lea.vmem %s447_s0, %s338_s15  ;;  %s172_s26 = scalar_lea.vmem %s450_s3, %s340_s23 }
  0x10   : > { %v174_v2 = vld [vmem:[%s166_s20] sm:$0xff]  ;;  %v175_v3 = vld [vmem:[%s166_s20 + $0x8] sm:$0xff]  ;;  %v176_v4 = vld [vmem:[%s166_s20 + $0x10] sm:$0xff] }
  0x11   : > { %v189_v5 = vmul.f32 %v341_v0, %v174_v2  ;;  %v190_v6 = vmul.f32 %v341_v0, %v175_v3  ;;  %v177_v7 = vld [vmem:[%s166_s20 + $0x18] sm:$0xff]  ;;  %v191_v8 = vmul.f32 %v341_v0, %v176_v4  ;;  %v178_v9 = vld [vmem:[%s166_s20 + $0x20] sm:$0xff]  ;;  %v179_v10 = vld [vmem:[%s166_s20 + $0x28] sm:$0xff] }
  0x12   : > { %v192_v11 = vmul.f32 %v341_v0, %v177_v7  ;;  %v193_v12 = vmul.f32 %v341_v0, %v178_v9  ;;  %v194_v13 = vmul.f32 %v341_v0, %v179_v10  ;;  %v180_v14 = vld [vmem:[%s166_s20 + $0x30] sm:$0xff]  ;;  %v181_v15 = vld [vmem:[%s166_s20 + $0x38] sm:$0xff] }
  0x13   : > { %v204_v16 = vadd.f32 %v342_v1, %v189_v5  ;;  %v205_v17 = vadd.f32 %v342_v1, %v190_v6  ;;  %v206_v18 = vadd.f32 %v342_v1, %v191_v8  ;;  %v195_v19 = vmul.f32 %v341_v0, %v180_v14 }
  0x14   : > { %v207_v20 = vadd.f32 %v342_v1, %v192_v11  ;;  %v208_v21 = vadd.f32 %v342_v1, %v193_v12  ;;  %v209_v22 = vadd.f32 %v342_v1, %v194_v13  ;;  %v196_v23 = vmul.f32 %v341_v0, %v181_v15 }
  0x15   : > { %vm212_vm0 = vcmp.gt.f32.partialorder %v204_v16, 0.0  ;;  %vm213_vm1 = vcmp.gt.f32.partialorder %v205_v17, 0.0  ;;  %v220_v24 = vmul.f32 0.2, %v204_v16  ;;  %v221_v25 = vmul.f32 0.2, %v205_v17 }
  0x16   : > { %vm214_vm2 = vcmp.gt.f32.partialorder %v206_v18, 0.0  ;;  %vm215_vm3 = vcmp.gt.f32.partialorder %v207_v20, 0.0  ;;  %v222_v26 = vmul.f32 0.2, %v206_v18  ;;  %v223_v27 = vmul.f32 0.2, %v207_v20 }
  0x17   : > { %v228_v28 = vsel %vm212_vm0, %v204_v16, %v220_v24  ;;  %v229_v29 = vsel %vm213_vm1, %v205_v17, %v221_v25  ;;  %vm216_vm4 = vcmp.gt.f32.partialorder %v208_v21, 0.0  ;;  %vm217_vm5 = vcmp.gt.f32.partialorder %v209_v22, 0.0 }
  0x18   : > { %v364_v30 = vpack.c.bf16 %v229_v29, %v228_v28  ;;  %v230_v31 = vsel %vm214_vm2, %v206_v18, %v222_v26  ;;  %v231_v32 = vsel %vm215_vm3, %v207_v20, %v223_v27  ;;  %v224_v33 = vmul.f32 0.2, %v208_v21 }
  0x19   : > { %v369_v34 = vpack.c.bf16 %v231_v32, %v230_v31  ;;  %v225_v35 = vmul.f32 0.2, %v209_v22  ;;  %v210_v36 = vadd.f32 %v342_v1, %v195_v19  ;;  %v211_v37 = vadd.f32 %v342_v1, %v196_v23 }
  0x1a   : > { %365 = vst [vmem:[%s172_s26] sm:$0xff] %v364_v30   ;;  %v232_v38 = vsel %vm216_vm4, %v208_v21, %v224_v33 }
  0x1b   : > { %381 = vst [vmem:[%s172_s26 + $0x8] sm:$0xff] %v369_v34   ;;  %v233_v39 = vsel %vm217_vm5, %v209_v22, %v225_v35  ;;  %vm218_vm6 = vcmp.gt.f32.partialorder %v210_v36, 0.0  ;;  %vm219_vm7 = vcmp.gt.f32.partialorder %v211_v37, 0.0  ;;  %v226_v40 = vmul.f32 0.2, %v210_v36 }
  0x1c   : > { %v374_v41 = vpack.c.bf16 %v233_v39, %v232_v38  ;;  %v227_v42 = vmul.f32 0.2, %v211_v37 }
  0x1d   : > { %v234_v43 = vsel %vm218_vm6, %v210_v36, %v226_v40 }
  0x1e   : > { %382 = vst [vmem:[%s172_s26 + $0x10] sm:$0xff] %v374_v41   ;;  %v235_v44 = vsel %vm219_vm7, %v211_v37, %v227_v42 }
  0x1f   : > { %v379_v45 = vpack.c.bf16 %v235_v44, %v234_v43 }
  0x21   : > { %383 = vst [vmem:[%s172_s26 + $0x18] sm:$0xff] %v379_v45  }
  0x22 PF: > { %s13_s12 = sadd.s32 1, %s398_s12  }
  0x23   : > { %p10_p4 = scmp.ge.s32.totalorder %s13_s12, 4  }
  0x25   :  { %12 = sbr.rel (!%p10_p4) target bundleno = 1 (0x1), region = 62 }

// kernel: _lambda_.9
= control target key start
LH: loop header
LB: loop body
LE: loop exit
PB: predicated region body
PF: predicated region fallthrough
CT: control target
= control target key end

     0   :  { %s518_s1 = inlined_call_operand.vmem [shape: bf16[256,128], index: 1, kind: input, shape index: {}]   ;;  %s519_s0 = inlined_call_operand.vmem [shape: bf16[32,256], index: 0, kind: input, shape index: {}]   ;;  %s520_s2 = inlined_call_operand.vmem [shape: f32[1,128], index: 2, kind: input, shape index: {}]   ;;  %s521_s3 = inlined_call_operand.vmem [shape: f32[1,128], index: 3, kind: input, shape index: {}]   ;;  %s522_s4 = inlined_call_operand.vmem [shape: bf16[32,128], index: 4, kind: output, shape index: {}]  }
   0x1   :  { %v397_v0 = vld [vmem:[%s518_s1 + $0x40] sm:$0xff]   ;;  %v399_v2 = vld [vmem:[%s518_s1 + $0x48] sm:$0xff]   ;;  %v401_v4 = vld [vmem:[%s518_s1 + $0x50] sm:$0xff]  }
   0x2   :  { %v398_v1 = vld [vmem:[%s518_s1] sm:$0xff]   ;;  %353 = vmatprep.subr.bf16.mxu0 %v397_v0  ;;  %381 = vmatprep.subr.bf16.mxu1 %v397_v0  ;;  %v400_v3 = vld [vmem:[%s518_s1 + $0x8] sm:$0xff]   ;;  %v402_v5 = vld [vmem:[%s518_s1 + $0x10] sm:$0xff]  }
   0x3   :  { %354 = vmatpush3.bf16.msra.mxu0 %v398_v1  ;;  %389 = vmatpush3.bf16.msra.mxu1 %v398_v1  ;;  %v403_v6 = vld [vmem:[%s518_s1 + $0x58] sm:$0xff]   ;;  %v405_v8 = vld [vmem:[%s518_s1 + $0x60] sm:$0xff]   ;;  %v407_v10 = vld [vmem:[%s518_s1 + $0x68] sm:$0xff]  }
   0x4   :  { %355 = vmatprep.subr.bf16.mxu0 %v399_v2  ;;  %382 = vmatprep.subr.bf16.mxu1 %v399_v2  ;;  %v404_v7 = vld [vmem:[%s518_s1 + $0x18] sm:$0xff]   ;;  %v406_v9 = vld [vmem:[%s518_s1 + $0x20] sm:$0xff]   ;;  %v408_v13 = vld [vmem:[%s518_s1 + $0x28] sm:$0xff]  }
   0x5   :  { %v415_v11 = vld [vmem:[%s519_s0 + $0x4] ss:$8 sps:$4 sm:$0xff]   ;;  %v418_v12 = vld [vmem:[%s519_s0 + $0x14] ss:$8 sps:$4 sm:$0xff]   ;;  %v413_v18 = vld [vmem:[%s519_s0] ss:$8 sps:$4 sm:$0xff]  }
   0x6   :  { %v409_v14 = vld [vmem:[%s518_s1 + $0x70] sm:$0xff]   ;;  %202 = vmatprep.mubr.bf16.mxu0 %v415_v11  ;;  %210 = vmatprep.mubr.bf16.mxu1 %v418_v12  ;;  %v411_v16 = vld [vmem:[%s518_s1 + $0x78] sm:$0xff]   ;;  %v332_v62 = vld [vmem:[%s520_s2] ss:$0 sm:$0xff] }
   0x7   :  { %356 = vmatpush3.bf16.msra.mxu0 %v400_v3  ;;  %390 = vmatpush3.bf16.msra.mxu1 %v400_v3  ;;  %v410_v15 = vld [vmem:[%s518_s1 + $0x30] sm:$0xff]   ;;  %v412_v17 = vld [vmem:[%s518_s1 + $0x38] sm:$0xff]   ;;  %v333_v3 = vld [vmem:[%s521_s3] ss:$0 sm:$0xff] }
   0x8   :  { %357 = vmatprep.subr.bf16.mxu0 %v401_v4  ;;  %383 = vmatprep.subr.bf16.mxu1 %v401_v4  ;;  %v416_v19 = vld [vmem:[%s519_s0 + $0x10] ss:$8 sps:$4 sm:$0xff]  }
   0xb   :  { %358 = vmatpush3.bf16.msra.mxu0 %v402_v5  ;;  %391 = vmatpush3.bf16.msra.mxu1 %v402_v5 }
   0xc   :  { %359 = vmatprep.subr.bf16.mxu0 %v403_v6  ;;  %384 = vmatprep.subr.bf16.mxu1 %v403_v6 }
   0xf   :  { %360 = vmatpush3.bf16.msra.mxu0 %v404_v7  ;;  %392 = vmatpush3.bf16.msra.mxu1 %v404_v7 }
  0x10   :  { %361 = vmatprep.subr.bf16.mxu0 %v405_v8  ;;  %385 = vmatprep.subr.bf16.mxu1 %v405_v8 }
  0x13   :  { %362 = vmatpush3.bf16.msra.mxu0 %v406_v9  ;;  %393 = vmatpush3.bf16.msra.mxu1 %v406_v9 }
  0x14   :  { %363 = vmatprep.subr.bf16.mxu0 %v407_v10  ;;  %386 = vmatprep.subr.bf16.mxu1 %v407_v10 }
  0x17   :  { %364 = vmatpush3.bf16.msra.mxu0 %v408_v13  ;;  %394 = vmatpush3.bf16.msra.mxu1 %v408_v13 }
  0x18   :  { %365 = vmatprep.subr.bf16.mxu0 %v409_v14  ;;  %387 = vmatprep.subr.bf16.mxu1 %v409_v14 }
  0x1b   :  { %366 = vmatpush3.bf16.msra.mxu0 %v410_v15  ;;  %395 = vmatpush3.bf16.msra.mxu1 %v410_v15 }
  0x1c   :  { %367 = vmatprep.subr.bf16.mxu0 %v411_v16  ;;  %388 = vmatprep.subr.bf16.mxu1 %v411_v16 }
  0x1f   :  { %368 = vmatpush3.bf16.msra.mxu0 %v412_v17  ;;  %396 = vmatpush3.bf16.msra.mxu1 %v412_v17 }
  0x22   :  { %203 = vmatmul.mubr.bf16.vlgmr.msra.gmra.mrb[0].mxu0 %v413_v18  ;;  %211 = vmatmul.mubr.bf16.vlgmr.msra.gmra.mrb[0].mxu1 %v416_v19 }
  0xf5   :  { %v369_v20 = vpop.f32.mrb[0].mxu0  ;;  %v375_v21 = vpop.f32.mrb[0].mxu1 }
  0xf6   :  { %v370_v22 = vpop.f32.mrb[1].mxu0  ;;  %v376_v23 = vpop.f32.mrb[1].mxu1 }
  0xf7   :  { %v371_v24 = vadd.f32 %v370_v22, %v369_v20  ;;  %v372_v25 = vpop.f32.mrb[2].mxu0  ;;  %v377_v26 = vadd.f32 %v376_v23, %v375_v21  ;;  %v378_v27 = vpop.f32.mrb[2].mxu1 }
  0xf8   :  { %v373_v28 = vpop.f32.mrb[3].mxu0  ;;  %v379_v29 = vpop.f32.mrb[3].mxu1 }
  0xf9   :  { %v374_v30 = vadd.f32 %v373_v28, %v372_v25  ;;  %v380_v31 = vadd.f32 %v379_v29, %v378_v27 }
  0xfb   :  { %v219_v32 = vadd.f32 %v374_v30, %v371_v24 }
  0xfd   :  { %v220_v33 = vadd.f32 %v377_v26, %v219_v32 }
  0xff   :  { %v221_v34 = vadd.f32 %v380_v31, %v220_v33 }
 0x101   :  { %v222_v35 = vrot.slane %v221_v34, 4 }
 0x103   :  { %v223_v36 = vadd.f32 %v222_v35, %v221_v34 }
 0x105   :  { %v224_v37 = vrot.slane %v223_v36, 2 }
 0x107   :  { %v225_v38 = vadd.f32 %v224_v37, %v223_v36 }
 0x109   :  { %v226_v39 = vrot.slane %v225_v38, 1 }
 0x10b   :  { %v227_v40 = vadd.f32 %v226_v39, %v225_v38 }
 0x10d   :  { %v229_v41 = vmul.f32 0.03125, %v227_v40 }
 0x10f   :  { %v230_v42 = vsub.f32 %v371_v24, %v229_v41  ;;  %v231_v43 = vsub.f32 %v374_v30, %v229_v41  ;;  %v232_v44 = vsub.f32 %v377_v26, %v229_v41  ;;  %v233_v45 = vsub.f32 %v380_v31, %v229_v41 }
 0x111   :  { %v234_v46 = vmul.f32 %v230_v42, %v230_v42  ;;  %v235_v47 = vmul.f32 %v231_v43, %v231_v43  ;;  %v236_v48 = vmul.f32 %v232_v44, %v232_v44  ;;  %v237_v50 = vmul.f32 %v233_v45, %v233_v45 }
 0x113   :  { %v238_v49 = vadd.f32 %v235_v47, %v234_v46 }
 0x115   :  { %v239_v51 = vadd.f32 %v238_v49, %v236_v48 }
 0x117   :  { %v240_v52 = vadd.f32 %v239_v51, %v237_v50 }
 0x119   :  { %v241_v53 = vrot.slane %v240_v52, 4 }
 0x11b   :  { %v242_v54 = vadd.f32 %v241_v53, %v240_v52 }
 0x11d   :  { %v243_v55 = vrot.slane %v242_v54, 2 }
 0x11f   :  { %v244_v56 = vadd.f32 %v243_v55, %v242_v54 }
 0x121   :  { %v245_v57 = vrot.slane %v244_v56, 1 }
 0x123   :  { %v246_v58 = vadd.f32 %v245_v57, %v244_v56 }
 0x125   :  { %v247_v59 = vmul.f32 0.03125, %v246_v58 }
 0x127   :  { %v248_v60 = vadd.f32 1e-05, %v247_v59 }
 0x129   :  { %419 = vrsqrt.f32 %v248_v60 }
 0x133   :  { %v420_v61 = vpop.eup %419 }
 0x134   :  { %v250_v63 = vmul.f32 %v420_v61, %v230_v42  ;;  %v251_v0 = vmul.f32 %v420_v61, %v231_v43  ;;  %v252_v1 = vmul.f32 %v420_v61, %v232_v44  ;;  %v253_v2 = vmul.f32 %v420_v61, %v233_v45 }
 0x136   :  { %v261_v4 = vmul.f32 %v332_v62, %v250_v63  ;;  %v262_v5 = vmul.f32 %v332_v62, %v251_v0  ;;  %v263_v6 = vmul.f32 %v332_v62, %v252_v1  ;;  %v264_v7 = vmul.f32 %v332_v62, %v253_v2 }
 0x138   :  { %v272_v8 = vadd.f32 %v333_v3, %v261_v4  ;;  %v273_v9 = vadd.f32 %v333_v3, %v262_v5  ;;  %v274_v10 = vadd.f32 %v333_v3, %v263_v6  ;;  %v275_v11 = vadd.f32 %v333_v3, %v264_v7 }
 0x13a   :  { %vm276_vm0 = vcmp.gt.f32.partialorder %v272_v8, 0.0  ;;  %vm277_vm1 = vcmp.gt.f32.partialorder %v273_v9, 0.0  ;;  %vm278_vm2 = vcmp.gt.f32.partialorder %v274_v10, 0.0  ;;  %vm279_vm3 = vcmp.gt.f32.partialorder %v275_v11, 0.0 }
 0x13b   :  { %v280_v12 = vmul.f32 0.2, %v272_v8  ;;  %v281_v13 = vmul.f32 0.2, %v273_v9  ;;  %v282_v14 = vmul.f32 0.2, %v274_v10 }
 0x13c   :  { %v283_v15 = vmul.f32 0.2, %v275_v11 }
 0x13d   :  { %v284_v16 = vsel %vm276_vm0, %v272_v8, %v280_v12  ;;  %v285_v17 = vsel %vm277_vm1, %v273_v9, %v281_v13  ;;  %v286_v18 = vsel %vm278_vm2, %v274_v10, %v282_v14 }
 0x13e   :  { %v287_v19 = vsel %vm279_vm3, %v275_v11, %v283_v15  ;;  %v345_v20 = vpack.c.bf16 %v285_v17, %v284_v16 }
 0x13f   :  { %v350_v21 = vpack.c.bf16 %v287_v19, %v286_v18 }
 0x140   :  { %346 = vst [vmem:[%s522_s4] sm:$0xff] %v345_v20  }
 0x141   :  { %352 = vst [vmem:[%s522_s4 + $0x8] sm:$0xff] %v350_v21  }

// kernel: _lambda_.10
= control target key start
LH: loop header
LB: loop body
LE: loop exit
PB: predicated region body
PF: predicated region fallthrough
CT: control target
= control target key end

     0   :  { %vm411_vm0 = vcmask 1041408   ;;  %s798_s1 = inlined_call_operand.vmem [shape: bf16[512,128], index: 1, kind: input, shape index: {}]   ;;  %s799_s0 = inlined_call_operand.vmem [shape: bf16[18,512], index: 0, kind: input, shape index: {}]   ;;  %s800_s2 = inlined_call_operand.vmem [shape: f32[1,128], index: 2, kind: input, shape index: {}]   ;;  %s801_s3 = inlined_call_operand.vmem [shape: f32[1,128], index: 3, kind: input, shape index: {}]   ;;  %s802_s4 = inlined_call_operand.vmem [shape: bf16[18,128], index: 4, kind: output, shape index: {}]  }
   0x1   :  { %v601_v0 = vld [vmem:[%s798_s1 + $0x40] sm:$0xff]   ;;  %v605_v4 = vld [vmem:[%s798_s1 + $0x48] sm:$0xff]   ;;  %v609_v8 = vld [vmem:[%s798_s1 + $0x50] sm:$0xff]  }
   0x2   :  { %v602_v1 = vld [vmem:[%s798_s1 + $0xc0] sm:$0xff]   ;;  %545 = vmatprep.subr.bf16.mxu0 %v601_v0  ;;  %v606_v5 = vld [vmem:[%s798_s1 + $0xc8] sm:$0xff]   ;;  %v610_v9 = vld [vmem:[%s798_s1 + $0xd0] sm:$0xff]  }
   0x3   :  { %v603_v2 = vld [vmem:[%s798_s1] sm:$0xff]   ;;  %573 = vmatprep.subr.bf16.mxu1 %v602_v1  ;;  %v607_v6 = vld [vmem:[%s798_s1 + $0x8] sm:$0xff]   ;;  %v611_v10 = vld [vmem:[%s798_s1 + $0x10] sm:$0xff]  }
   0x4   :  { %v604_v3 = vld [vmem:[%s798_s1 + $0x80] sm:$0xff]   ;;  %546 = vmatpush3.bf16.msra.mxu0 %v603_v2  ;;  %v608_v7 = vld [vmem:[%s798_s1 + $0x88] sm:$0xff]   ;;  %v612_v11 = vld [vmem:[%s798_s1 + $0x90] sm:$0xff]  }
   0x5   :  { %574 = vmatpush3.bf16.msra.mxu1 %v604_v3  ;;  %547 = vmatprep.subr.bf16.mxu0 %v605_v4  ;;  %v613_v12 = vld [vmem:[%s798_s1 + $0x58] sm:$0xff]   ;;  %v617_v16 = vld [vmem:[%s798_s1 + $0x60] sm:$0xff]   ;;  %v621_v20 = vld [vmem:[%s798_s1 + $0x68] sm:$0xff]  }
   0x6   :  { %575 = vmatprep.subr.bf16.mxu1 %v606_v5  ;;  %v614_v13 = vld [vmem:[%s798_s1 + $0xd8] sm:$0xff]   ;;  %v618_v17 = vld [vmem:[%s798_s1 + $0xe0] sm:$0xff]   ;;  %v622_v21 = vld [vmem:[%s798_s1 + $0xe8] sm:$0xff]  }
   0x7   :  { %v615_v14 = vld [vmem:[%s798_s1 + $0x18] sm:$0xff]   ;;  %v619_v18 = vld [vmem:[%s798_s1 + $0x20] sm:$0xff]   ;;  %v623_v22 = vld [vmem:[%s798_s1 + $0x28] sm:$0xff]  }
   0x8   :  { %548 = vmatpush3.bf16.msra.mxu0 %v607_v6  ;;  %v616_v15 = vld [vmem:[%s798_s1 + $0x98] sm:$0xff]   ;;  %v620_v19 = vld [vmem:[%s798_s1 + $0xa0] sm:$0xff]   ;;  %v624_v23 = vld [vmem:[%s798_s1 + $0xa8] sm:$0xff]  }
   0x9   :  { %576 = vmatpush3.bf16.msra.mxu1 %v608_v7  ;;  %549 = vmatprep.subr.bf16.mxu0 %v609_v8  ;;  %v625_v24 = vld [vmem:[%s798_s1 + $0x70] sm:$0xff]   ;;  %v629_v28 = vld [vmem:[%s798_s1 + $0x78] sm:$0xff]   ;;  %v22_v36 = vld [vmem:[%s799_s0 + $0x20] sm:$0x11] }
   0xa   :  { %577 = vmatprep.subr.bf16.mxu1 %v610_v9  ;;  %v626_v25 = vld [vmem:[%s798_s1 + $0xf0] sm:$0xff]   ;;  %v630_v29 = vld [vmem:[%s798_s1 + $0xf8] sm:$0xff]   ;;  %v497_v37 = vcombine.high %v22_v36, %v22_v36  ;;  %v23_v38 = vld [vmem:[%s799_s0 + $0x28] sm:$0x11]  ;;  %v496_v40 = vcombine.low %v22_v36, %v22_v36 }
   0xb   :  { %v627_v26 = vld [vmem:[%s798_s1 + $0x30] sm:$0xff]   ;;  %v631_v30 = vld [vmem:[%s798_s1 + $0x38] sm:$0xff]   ;;  %v499_v39 = vcombine.high %v23_v38, %v23_v38  ;;  %v498_v41 = vcombine.low %v23_v38, %v23_v38 }
   0xc   :  { %550 = vmatpush3.bf16.msra.mxu0 %v611_v10  ;;  %v628_v27 = vld [vmem:[%s798_s1 + $0xb0] sm:$0xff]   ;;  %v632_v31 = vld [vmem:[%s798_s1 + $0xb8] sm:$0xff]  }
   0xd   :  { %578 = vmatpush3.bf16.msra.mxu1 %v612_v11  ;;  %551 = vmatprep.subr.bf16.mxu0 %v613_v12  ;;  %v633_v32 = vld [vmem:[%s799_s0] ss:$16 sps:$4 sm:$0xff]   ;;  %v635_v33 = vld [vmem:[%s799_s0 + $0x4] ss:$16 sps:$4 sm:$0xff]   ;;  %v636_v34 = vld [vmem:[%s799_s0 + $0x8] ss:$16 sps:$4 sm:$0xff]  }
   0xe   :  { %579 = vmatprep.subr.bf16.mxu1 %v614_v13  ;;  %v638_v35 = vld [vmem:[%s799_s0 + $0xc] ss:$16 sps:$4 sm:$0xff]   ;;  %346 = vmatprep.mubr.bf16.mxu0 %v635_v33 }
   0xf   :  { %394 = vmatprep.mubr.bf16.mxu1 %v638_v35  ;;  %v533_v35 = vld [vmem:[%s801_s3] ss:$0 sm:$0xff] }
  0x10   :  { %552 = vmatpush3.bf16.msra.mxu0 %v615_v14 }
  0x11   :  { %580 = vmatpush3.bf16.msra.mxu1 %v616_v15  ;;  %553 = vmatprep.subr.bf16.mxu0 %v617_v16 }
  0x12   :  { %581 = vmatprep.subr.bf16.mxu1 %v618_v17 }
  0x14   :  { %554 = vmatpush3.bf16.msra.mxu0 %v619_v18 }
  0x15   :  { %582 = vmatpush3.bf16.msra.mxu1 %v620_v19  ;;  %555 = vmatprep.subr.bf16.mxu0 %v621_v20 }
  0x16   :  { %583 = vmatprep.subr.bf16.mxu1 %v622_v21 }
  0x18   :  { %556 = vmatpush3.bf16.msra.mxu0 %v623_v22 }
  0x19   :  { %584 = vmatpush3.bf16.msra.mxu1 %v624_v23  ;;  %557 = vmatprep.subr.bf16.mxu0 %v625_v24 }
  0x1a   :  { %585 = vmatprep.subr.bf16.mxu1 %v626_v25 }
  0x1c   :  { %558 = vmatpush3.bf16.msra.mxu0 %v627_v26 }
  0x1d   :  { %586 = vmatpush3.bf16.msra.mxu1 %v628_v27  ;;  %559 = vmatprep.subr.bf16.mxu0 %v629_v28 }
  0x1e   :  { %587 = vmatprep.subr.bf16.mxu1 %v630_v29 }
  0x20   :  { %560 = vmatpush3.bf16.msra.mxu0 %v631_v30 }
  0x21   :  { %588 = vmatpush3.bf16.msra.mxu1 %v632_v31  ;;  %v532_v31 = vld [vmem:[%s800_s2] ss:$0 sm:$0xff] }
  0x23   :  { %347 = vmatmul.mubr.bf16.vlgmr.msra.gmra.mrb[0].mxu0 %v633_v32 }
  0x24   :  { %395 = vmatmul.mubr.bf16.vlgmr.msra.gmra.mrb[0].mxu1 %v636_v34  ;;  %354 = vmatprep.mubr.bf16.mxu0 %v497_v37 }
  0x25   :  { %402 = vmatprep.mubr.bf16.mxu1 %v499_v39 }
  0x2b   :  { %355 = vmatmul.mubr.bf16.gmra.mrb[4].mxu0 %v496_v40 }
  0x2c   :  { %403 = vmatmul.mubr.bf16.gmra.mrb[4].mxu1 %v498_v41 }
  0xf6   :  { %v561_v42 = vpop.f32.mrb[0].mxu0 }
  0xf7   :  { %v589_v43 = vpop.f32.mrb[0].mxu1  ;;  %v562_v44 = vpop.f32.mrb[1].mxu0 }
  0xf8   :  { %v563_v45 = vadd.f32 %v562_v44, %v561_v42  ;;  %v590_v46 = vpop.f32.mrb[1].mxu1  ;;  %v564_v47 = vpop.f32.mrb[2].mxu0 }
  0xf9   :  { %v591_v48 = vadd.f32 %v590_v46, %v589_v43  ;;  %v592_v49 = vpop.f32.mrb[2].mxu1  ;;  %v565_v50 = vpop.f32.mrb[3].mxu0 }
  0xfa   :  { %v566_v51 = vadd.f32 %v565_v50, %v564_v47  ;;  %v593_v52 = vpop.f32.mrb[3].mxu1 }
  0xfb   :  { %v397_v53 = vadd.f32 %v591_v48, %v563_v45  ;;  %v594_v54 = vadd.f32 %v593_v52, %v592_v49 }
  0xfd   :  { %v400_v55 = vadd.f32 %v594_v54, %v566_v51 }
  0xfe   :  { %v567_v56 = vpop.f32.mrb[4].mxu0 }
  0xff   :  { %v410_v57 = vadd.f32 %v400_v55, %v397_v53  ;;  %v595_v58 = vpop.f32.mrb[4].mxu1  ;;  %v568_v59 = vpop.f32.mrb[5].mxu0 }
 0x100   :  { %v569_v60 = vadd.f32 %v568_v59, %v567_v56  ;;  %v596_v61 = vpop.f32.mrb[5].mxu1  ;;  %v570_v62 = vpop.f32.mrb[6].mxu0 }
 0x101   :  { %v597_v63 = vadd.f32 %v596_v61, %v595_v58  ;;  %v598_v0 = vpop.f32.mrb[6].mxu1  ;;  %v571_v1 = vpop.f32.mrb[7].mxu0 }
 0x102   :  { %v599_v2 = vpop.f32.mrb[7].mxu1 }
 0x103   :  { %v405_v3 = vadd.f32 %v597_v63, %v569_v60 }
 0x105   :  { %v412_v4 = vsel %vm411_vm0, %v405_v3, 0.0 }
 0x106   :  { %v413_v5 = vadd.f32 %v412_v4, %v410_v57 }
 0x108   :  { %v414_v6 = vrot.slane %v413_v5, 4 }
 0x10a   :  { %v415_v7 = vadd.f32 %v414_v6, %v413_v5 }
 0x10c   :  { %v416_v8 = vrot.slane %v415_v7, 2 }
 0x10e   :  { %v417_v9 = vadd.f32 %v416_v8, %v415_v7 }
 0x110   :  { %v418_v10 = vrot.slane %v417_v9, 1 }
 0x112   :  { %v419_v11 = vadd.f32 %v418_v10, %v417_v9 }
 0x114   :  { %v421_v12 = vmul.f32 0.055555556, %v419_v11 }
 0x116   :  { %v422_v13 = vsub.f32 %v397_v53, %v421_v12  ;;  %v423_v14 = vsub.f32 %v400_v55, %v421_v12  ;;  %v424_v15 = vsub.f32 %v405_v3, %v421_v12 }
 0x118   :  { %v425_v16 = vmul.f32 %v422_v13, %v422_v13  ;;  %v426_v17 = vmul.f32 %v423_v14, %v423_v14  ;;  %v427_v18 = vmul.f32 %v424_v15, %v424_v15 }
 0x11a   :  { %v428_v19 = vadd.f32 %v426_v17, %v425_v16  ;;  %v429_v20 = vsel %vm411_vm0, %v427_v18, 0.0 }
 0x11c   :  { %v430_v21 = vadd.f32 %v429_v20, %v428_v19 }
 0x11e   :  { %v431_v22 = vrot.slane %v430_v21, 4 }
 0x120   :  { %v432_v23 = vadd.f32 %v431_v22, %v430_v21 }
 0x122   :  { %v433_v24 = vrot.slane %v432_v23, 2 }
 0x124   :  { %v434_v25 = vadd.f32 %v433_v24, %v432_v23 }
 0x126   :  { %v435_v26 = vrot.slane %v434_v25, 1 }
 0x128   :  { %v436_v27 = vadd.f32 %v435_v26, %v434_v25 }
 0x12a   :  { %v437_v28 = vmul.f32 0.055555556, %v436_v27 }
 0x12c   :  { %v438_v29 = vadd.f32 1e-05, %v437_v28 }
 0x12e   :  { %643 = vrsqrt.f32 %v438_v29 }
 0x138   :  { %v644_v30 = vpop.eup %643 }
 0x139   :  { %v440_v32 = vmul.f32 %v644_v30, %v422_v13  ;;  %v441_v33 = vmul.f32 %v644_v30, %v423_v14  ;;  %v442_v34 = vmul.f32 %v644_v30, %v424_v15 }
 0x13b   :  { %v450_v36 = vmul.f32 %v532_v31, %v440_v32  ;;  %v451_v37 = vmul.f32 %v532_v31, %v441_v33  ;;  %v452_v38 = vmul.f32 %v532_v31, %v442_v34 }
 0x13d   :  { %v460_v39 = vadd.f32 %v533_v35, %v450_v36  ;;  %v461_v40 = vadd.f32 %v533_v35, %v451_v37  ;;  %v462_v41 = vadd.f32 %v533_v35, %v452_v38 }
 0x13f   :  { %vm463_vm1 = vcmp.gt.f32.partialorder %v460_v39, 0.0  ;;  %vm464_vm2 = vcmp.gt.f32.partialorder %v461_v40, 0.0  ;;  %vm465_vm3 = vcmp.gt.f32.partialorder %v462_v41, 0.0  ;;  %v466_v42 = vmul.f32 0.2, %v460_v39 }
 0x140   :  { %v467_v43 = vmul.f32 0.2, %v461_v40  ;;  %v468_v44 = vmul.f32 0.2, %v462_v41 }
 0x141   :  { %v469_v45 = vsel %vm463_vm1, %v460_v39, %v466_v42 }
 0x142   :  { %v470_v46 = vsel %vm464_vm2, %v461_v40, %v467_v43  ;;  %v471_v47 = vsel %vm465_vm3, %v462_v41, %v468_v44 }
 0x143   :  { %v539_v48 = vpack.c.bf16 %v471_v47, %v471_v47  ;;  %v543_v49 = vpack.c.bf16 %v470_v46, %v469_v45 }
 0x145   :  { %544 = vst [vmem:[%s802_s4] sm:$0xff] %v543_v49   ;;  %487 = vst [vmem:[%s802_s4 + $0x8] sm:$0x1] %v539_v48 }

// kernel: _lambda_.11
= control target key start
LH: loop header
LB: loop body
LE: loop exit
PB: predicated region body
PF: predicated region fallthrough
CT: control target
= control target key end

     0   :  { %s1194_s1 = inlined_call_operand.vmem [shape: bf16[1024,128], index: 1, kind: input, shape index: {}]   ;;  %s1195_s0 = inlined_call_operand.vmem [shape: bf16[8,1024], index: 0, kind: input, shape index: {}]   ;;  %s1196_s2 = inlined_call_operand.vmem [shape: f32[1,128], index: 2, kind: input, shape index: {}]   ;;  %s1197_s3 = inlined_call_operand.vmem [shape: f32[8,128], index: 3, kind: output, shape index: {}]  }
   0x1   :  { %v892_v0 = vld [vmem:[%s1194_s1 + $0x40] sm:$0xff]   ;;  %v896_v4 = vld [vmem:[%s1194_s1 + $0x48] sm:$0xff]   ;;  %v900_v8 = vld [vmem:[%s1194_s1 + $0x50] sm:$0xff]  }
   0x2   :  { %v893_v1 = vld [vmem:[%s1194_s1 + $0xc0] sm:$0xff]   ;;  %804 = vmatprep.subr.bf16.mxu0 %v892_v0  ;;  %v897_v5 = vld [vmem:[%s1194_s1 + $0xc8] sm:$0xff]   ;;  %v901_v9 = vld [vmem:[%s1194_s1 + $0xd0] sm:$0xff]  }
   0x3   :  { %v894_v2 = vld [vmem:[%s1194_s1] sm:$0xff]   ;;  %826 = vmatprep.subr.bf16.mxu1 %v893_v1  ;;  %v898_v6 = vld [vmem:[%s1194_s1 + $0x8] sm:$0xff]   ;;  %v902_v10 = vld [vmem:[%s1194_s1 + $0x10] sm:$0xff]  }
   0x4   :  { %v895_v3 = vld [vmem:[%s1194_s1 + $0x80] sm:$0xff]   ;;  %805 = vmatpush3.bf16.msra.mxu0 %v894_v2  ;;  %v899_v7 = vld [vmem:[%s1194_s1 + $0x88] sm:$0xff]   ;;  %v903_v11 = vld [vmem:[%s1194_s1 + $0x90] sm:$0xff]  }
   0x5   :  { %827 = vmatpush3.bf16.msra.mxu1 %v895_v3  ;;  %806 = vmatprep.subr.bf16.mxu0 %v896_v4  ;;  %v904_v12 = vld [vmem:[%s1194_s1 + $0x58] sm:$0xff]   ;;  %v908_v16 = vld [vmem:[%s1194_s1 + $0x60] sm:$0xff]   ;;  %v912_v20 = vld [vmem:[%s1194_s1 + $0x68] sm:$0xff]  }
   0x6   :  { %828 = vmatprep.subr.bf16.mxu1 %v897_v5  ;;  %v905_v13 = vld [vmem:[%s1194_s1 + $0xd8] sm:$0xff]   ;;  %v909_v17 = vld [vmem:[%s1194_s1 + $0xe0] sm:$0xff]   ;;  %v913_v21 = vld [vmem:[%s1194_s1 + $0xe8] sm:$0xff]  }
   0x7   :  { %v906_v14 = vld [vmem:[%s1194_s1 + $0x18] sm:$0xff]   ;;  %v910_v18 = vld [vmem:[%s1194_s1 + $0x20] sm:$0xff]   ;;  %v914_v22 = vld [vmem:[%s1194_s1 + $0x28] sm:$0xff]  }
   0x8   :  { %807 = vmatpush3.bf16.msra.mxu0 %v898_v6  ;;  %v907_v15 = vld [vmem:[%s1194_s1 + $0x98] sm:$0xff]   ;;  %v911_v19 = vld [vmem:[%s1194_s1 + $0xa0] sm:$0xff]   ;;  %v915_v23 = vld [vmem:[%s1194_s1 + $0xa8] sm:$0xff]  }
   0x9   :  { %829 = vmatpush3.bf16.msra.mxu1 %v899_v7  ;;  %808 = vmatprep.subr.bf16.mxu0 %v900_v8  ;;  %v916_v24 = vld [vmem:[%s1194_s1 + $0x70] sm:$0xff]   ;;  %v920_v28 = vld [vmem:[%s1194_s1 + $0x78] sm:$0xff]   ;;  %v15_v32 = vld [vmem:[%s1195_s0] sm:$0xff] }
   0xa   :  { %830 = vmatprep.subr.bf16.mxu1 %v901_v9  ;;  %v917_v25 = vld [vmem:[%s1194_s1 + $0xf0] sm:$0xff]   ;;  %v921_v29 = vld [vmem:[%s1194_s1 + $0xf8] sm:$0xff]   ;;  %v16_v33 = vld [vmem:[%s1195_s0 + $0x8] sm:$0xff]  ;;  %v732_v34 = vcombine.low %v15_v32, %v15_v32  ;;  %v733_v35 = vcombine.high %v15_v32, %v15_v32 }
   0xb   :  { %v918_v26 = vld [vmem:[%s1194_s1 + $0x30] sm:$0xff]   ;;  %v922_v30 = vld [vmem:[%s1194_s1 + $0x38] sm:$0xff]   ;;  %v734_v36 = vcombine.low %v16_v33, %v16_v33  ;;  %v735_v37 = vcombine.high %v16_v33, %v16_v33  ;;  %v928_v38 = vld [vmem:[%s1194_s1 + $0x140] sm:$0xff]  }
   0xc   :  { %809 = vmatpush3.bf16.msra.mxu0 %v902_v10  ;;  %v919_v27 = vld [vmem:[%s1194_s1 + $0xb0] sm:$0xff]   ;;  %v923_v31 = vld [vmem:[%s1194_s1 + $0xb8] sm:$0xff]   ;;  %v929_v39 = vld [vmem:[%s1194_s1 + $0x1c0] sm:$0xff]   ;;  %598 = vmatprep.mubr.bf16.mxu0 %v733_v35 }
   0xd   :  { %831 = vmatpush3.bf16.msra.mxu1 %v903_v11  ;;  %810 = vmatprep.subr.bf16.mxu0 %v904_v12  ;;  %v930_v40 = vld [vmem:[%s1194_s1 + $0x100] sm:$0xff]   ;;  %v932_v42 = vld [vmem:[%s1194_s1 + $0x148] sm:$0xff]   ;;  %v936_v46 = vld [vmem:[%s1194_s1 + $0x150] sm:$0xff]  }
   0xe   :  { %832 = vmatprep.subr.bf16.mxu1 %v905_v13  ;;  %638 = vmatprep.mubr.bf16.mxu1 %v735_v37  ;;  %v931_v41 = vld [vmem:[%s1194_s1 + $0x180] sm:$0xff]   ;;  %v933_v43 = vld [vmem:[%s1194_s1 + $0x1c8] sm:$0xff]   ;;  %v937_v47 = vld [vmem:[%s1194_s1 + $0x1d0] sm:$0xff]  }
   0xf   :  { %v934_v44 = vld [vmem:[%s1194_s1 + $0x108] sm:$0xff]   ;;  %v938_v48 = vld [vmem:[%s1194_s1 + $0x110] sm:$0xff]   ;;  %v940_v50 = vld [vmem:[%s1194_s1 + $0x158] sm:$0xff]  }
  0x10   :  { %811 = vmatpush3.bf16.msra.mxu0 %v906_v14  ;;  %v935_v45 = vld [vmem:[%s1194_s1 + $0x188] sm:$0xff]   ;;  %v939_v49 = vld [vmem:[%s1194_s1 + $0x190] sm:$0xff]   ;;  %v941_v51 = vld [vmem:[%s1194_s1 + $0x1d8] sm:$0xff]  }
  0x11   :  { %833 = vmatpush3.bf16.msra.mxu1 %v907_v15  ;;  %812 = vmatprep.subr.bf16.mxu0 %v908_v16  ;;  %v942_v52 = vld [vmem:[%s1194_s1 + $0x118] sm:$0xff]   ;;  %v944_v54 = vld [vmem:[%s1194_s1 + $0x160] sm:$0xff]   ;;  %v948_v58 = vld [vmem:[%s1194_s1 + $0x168] sm:$0xff]  }
  0x12   :  { %834 = vmatprep.subr.bf16.mxu1 %v909_v17  ;;  %v943_v53 = vld [vmem:[%s1194_s1 + $0x198] sm:$0xff]   ;;  %v945_v55 = vld [vmem:[%s1194_s1 + $0x1e0] sm:$0xff]   ;;  %v949_v59 = vld [vmem:[%s1194_s1 + $0x1e8] sm:$0xff]  }
  0x13   :  { %v946_v56 = vld [vmem:[%s1194_s1 + $0x120] sm:$0xff]   ;;  %v950_v60 = vld [vmem:[%s1194_s1 + $0x128] sm:$0xff]   ;;  %v952_v62 = vld [vmem:[%s1194_s1 + $0x170] sm:$0xff]  }
  0x14   :  { %813 = vmatpush3.bf16.msra.mxu0 %v910_v18  ;;  %v947_v57 = vld [vmem:[%s1194_s1 + $0x1a0] sm:$0xff]   ;;  %v951_v61 = vld [vmem:[%s1194_s1 + $0x1a8] sm:$0xff]   ;;  %v953_v63 = vld [vmem:[%s1194_s1 + $0x1f0] sm:$0xff]  }
  0x15   :  { %835 = vmatpush3.bf16.msra.mxu1 %v911_v19  ;;  %814 = vmatprep.subr.bf16.mxu0 %v912_v20  ;;  %v954_v0 = vld [vmem:[%s1194_s1 + $0x130] sm:$0xff]   ;;  %v956_v2 = vld [vmem:[%s1194_s1 + $0x178] sm:$0xff]   ;;  %v731_v14 = vld [vmem:[%s1196_s2] ss:$0 sm:$0xff] }
  0x16   :  { %836 = vmatprep.subr.bf16.mxu1 %v913_v21  ;;  %v955_v1 = vld [vmem:[%s1194_s1 + $0x1b0] sm:$0xff]   ;;  %v957_v3 = vld [vmem:[%s1194_s1 + $0x1f8] sm:$0xff]  }
  0x17   :  { %v958_v4 = vld [vmem:[%s1194_s1 + $0x138] sm:$0xff]   ;;  %v17_v6 = vld [vmem:[%s1195_s0 + $0x10] sm:$0xff] }
  0x18   :  { %815 = vmatpush3.bf16.msra.mxu0 %v914_v22  ;;  %v959_v5 = vld [vmem:[%s1194_s1 + $0x1b8] sm:$0xff]   ;;  %v736_v7 = vcombine.low %v17_v6, %v17_v6  ;;  %v737_v8 = vcombine.high %v17_v6, %v17_v6 }
  0x19   :  { %837 = vmatpush3.bf16.msra.mxu1 %v915_v23  ;;  %816 = vmatprep.subr.bf16.mxu0 %v916_v24  ;;  %v18_v9 = vld [vmem:[%s1195_s0 + $0x18] sm:$0xff] }
  0x1a   :  { %838 = vmatprep.subr.bf16.mxu1 %v917_v25  ;;  %v738_v10 = vcombine.low %v18_v9, %v18_v9  ;;  %v739_v11 = vcombine.high %v18_v9, %v18_v9 }
  0x1c   :  { %817 = vmatpush3.bf16.msra.mxu0 %v918_v26 }
  0x1d   :  { %839 = vmatpush3.bf16.msra.mxu1 %v919_v27  ;;  %818 = vmatprep.subr.bf16.mxu0 %v920_v28 }
  0x1e   :  { %840 = vmatprep.subr.bf16.mxu1 %v921_v29 }
  0x20   :  { %819 = vmatpush3.bf16.msra.mxu0 %v922_v30 }
  0x21   :  { %841 = vmatpush3.bf16.msra.mxu1 %v923_v31  ;;  %848 = vmatprep.subr.bf16.mxu0 %v928_v38 }
  0x22   :  { %870 = vmatprep.subr.bf16.mxu1 %v929_v39 }
  0x23   :  { %599 = vmatmul.mubr.bf16.vlgmr.msra.gmra.mrb[0].mxu0 %v732_v34 }
  0x24   :  { %639 = vmatmul.mubr.bf16.vlgmr.msra.gmra.mrb[0].mxu1 %v734_v36  ;;  %849 = vmatpush3.bf16.msra.mxu0 %v930_v40 }
  0x25   :  { %871 = vmatpush3.bf16.msra.mxu1 %v931_v41  ;;  %850 = vmatprep.subr.bf16.mxu0 %v932_v42 }
  0x26   :  { %872 = vmatprep.subr.bf16.mxu1 %v933_v43  ;;  %678 = vmatprep.mubr.bf16.mxu0 %v737_v8 }
  0x27   :  { %718 = vmatprep.mubr.bf16.mxu1 %v739_v11 }
  0x28   :  { %851 = vmatpush3.bf16.msra.mxu0 %v934_v44 }
  0x29   :  { %873 = vmatpush3.bf16.msra.mxu1 %v935_v45  ;;  %852 = vmatprep.subr.bf16.mxu0 %v936_v46 }
  0x2a   :  { %874 = vmatprep.subr.bf16.mxu1 %v937_v47 }
  0x2c   :  { %853 = vmatpush3.bf16.msra.mxu0 %v938_v48 }
  0x2d   :  { %875 = vmatpush3.bf16.msra.mxu1 %v939_v49  ;;  %854 = vmatprep.subr.bf16.mxu0 %v940_v50 }
  0x2e   :  { %876 = vmatprep.subr.bf16.mxu1 %v941_v51 }
  0x30   :  { %855 = vmatpush3.bf16.msra.mxu0 %v942_v52 }
  0x31   :  { %877 = vmatpush3.bf16.msra.mxu1 %v943_v53  ;;  %856 = vmatprep.subr.bf16.mxu0 %v944_v54 }
  0x32   :  { %878 = vmatprep.subr.bf16.mxu1 %v945_v55 }
  0x34   :  { %857 = vmatpush3.bf16.msra.mxu0 %v946_v56 }
  0x35   :  { %879 = vmatpush3.bf16.msra.mxu1 %v947_v57  ;;  %858 = vmatprep.subr.bf16.mxu0 %v948_v58 }
  0x36   :  { %880 = vmatprep.subr.bf16.mxu1 %v949_v59 }
  0x38   :  { %859 = vmatpush3.bf16.msra.mxu0 %v950_v60 }
  0x39   :  { %881 = vmatpush3.bf16.msra.mxu1 %v951_v61  ;;  %860 = vmatprep.subr.bf16.mxu0 %v952_v62 }
  0x3a   :  { %882 = vmatprep.subr.bf16.mxu1 %v953_v63 }
  0x3c   :  { %861 = vmatpush3.bf16.msra.mxu0 %v954_v0 }
  0x3d   :  { %883 = vmatpush3.bf16.msra.mxu1 %v955_v1  ;;  %862 = vmatprep.subr.bf16.mxu0 %v956_v2 }
  0x3e   :  { %884 = vmatprep.subr.bf16.mxu1 %v957_v3 }
  0x40   :  { %863 = vmatpush3.bf16.msra.mxu0 %v958_v4 }
  0x41   :  { %885 = vmatpush3.bf16.msra.mxu1 %v959_v5 }
  0x43   :  { %679 = vmatmul.mubr.bf16.vlgmr.msra.gmra.mrb[4].mxu0 %v736_v7 }
  0x44   :  { %719 = vmatmul.mubr.bf16.vlgmr.msra.gmra.mrb[4].mxu1 %v738_v10 }
  0xf6   :  { %v820_v12 = vpop.f32.mrb[0].mxu0 }
  0xf7   :  { %v842_v13 = vpop.f32.mrb[0].mxu1  ;;  %v821_v15 = vpop.f32.mrb[1].mxu0 }
  0xf8   :  { %v843_v16 = vpop.f32.mrb[1].mxu1  ;;  %v822_v17 = vadd.f32 %v821_v15, %v820_v12  ;;  %v823_v19 = vpop.f32.mrb[2].mxu0 }
  0xf9   :  { %v844_v18 = vadd.f32 %v843_v16, %v842_v13  ;;  %v845_v20 = vpop.f32.mrb[2].mxu1  ;;  %v824_v21 = vpop.f32.mrb[3].mxu0 }
  0xfa   :  { %v846_v22 = vpop.f32.mrb[3].mxu1  ;;  %v601_v23 = vadd.f32 %v822_v17, %v731_v14 }
  0xfc   :  { %v641_v24 = vadd.f32 %v844_v18, %v601_v23 }
 0x116   :  { %v864_v25 = vpop.f32.mrb[4].mxu0 }
 0x117   :  { %v886_v26 = vpop.f32.mrb[4].mxu1  ;;  %v865_v27 = vpop.f32.mrb[5].mxu0 }
 0x118   :  { %v887_v28 = vpop.f32.mrb[5].mxu1  ;;  %v866_v29 = vadd.f32 %v865_v27, %v864_v25  ;;  %v867_v31 = vpop.f32.mrb[6].mxu0 }
 0x119   :  { %v888_v30 = vadd.f32 %v887_v28, %v886_v26  ;;  %v889_v32 = vpop.f32.mrb[6].mxu1  ;;  %v868_v33 = vpop.f32.mrb[7].mxu0 }
 0x11a   :  { %v890_v34 = vpop.f32.mrb[7].mxu1  ;;  %v681_v35 = vadd.f32 %v866_v29, %v641_v24 }
 0x11c   :  { %v721_v36 = vadd.f32 %v888_v30, %v681_v35 }
 0x11e   :  { %726 = vst [vmem:[%s1197_s3] sm:$0xff] %v721_v36 }

</bundles_post_ra>
